<compile_context>
chip_gen: v7x
topology: tpu7x:2x2x1
jax: 0.10.0
libtpu: 0.0.40
codegen_flags: <defaults>
</compile_context>

<pallas_src>
import math
import numpy as np
import jax
import jax.numpy as jnp
from jax import lax
from jax.experimental import pallas as pl
from jax.experimental.pallas import tpu as pltpu

INF = 1000000000000.0  # matches the PyTorch module

# ----------------- config -----------------
HIDDEN = 32                           # config.hidden_size
NUM_ATTN_HEADS = 4                    # config.num_attention_heads
ATTN_HEAD = HIDDEN // NUM_ATTN_HEADS  # 8
INTER = 64                            # config.intermediate_size
PTR_HEADS = 4                         # config.pointer_cls_heads
PTR_HEAD = HIDDEN // NUM_ATTN_HEADS   # SCAPointer.head_size == 8
PTR_DIM = PTR_HEADS * PTR_HEAD        # 32
EPS = 1e-6                            # config.layer_norm_eps
INIT_STD = 0.2
POINTER_WITH_SCA = True
POINTER_SCALE = True
POINTER_ROPE = True
TRIL_MASK = True
SCALE = 1.0 / math.sqrt(PTR_HEAD) if POINTER_SCALE else 1.0


def _lane_offsets(sizes):
    offs, o = [], 0
    for sz in sizes:
        offs.append((o, o + sz))
        o += sz
    return offs


# Packed-operand lane layouts (must match pack_params).
(_B_QKV, _B_O1, _B_O2, _NS1, _NS2, _B1A, _B1B, _B2A, _B2B) = _lane_offsets(
    [6 * HIDDEN, HIDDEN, HIDDEN, HIDDEN, HIDDEN, INTER, INTER, 2 * PTR_DIM, 2 * PTR_DIM])
(_W_O1, _W_O2, _W_1A, _W_1B) = _lane_offsets([HIDDEN, HIDDEN, INTER, INTER])
(_W_2A, _W_2B) = _lane_offsets([2 * PTR_DIM, 2 * PTR_DIM])


def _gelu_exact(x):
    # nn.GELU() default = exact erf-based GELU
    return 0.5 * x * (1.0 + lax.erf(x / math.sqrt(2.0)))


def _sca_branch(q_rows, k_all, v_all, resid, w_o, b_o, ns, ext_mask):
    """One SCAAttention branch restricted to q_rows.shape[0] query rows (keys/values are full-S).
    1/sqrt(dh) is pre-folded into the Q weights; eval mode -> dropouts are identity."""
    # TODO(synk): for S >= ~128 pack the per-head QK^T / PV matmuls block-diagonally to fill
    #             the MXU contraction depth and delete the lane-shuffle concatenate.
    ctx_parts = []
    for h in range(NUM_ATTN_HEADS):
        sl = slice(h * ATTN_HEAD, (h + 1) * ATTN_HEAD)
        scores = lax.dot_general(q_rows[:, sl], k_all[:, sl], (((1,), (1,)), ((), ())),
                                 preferred_element_type=jnp.float32)       # (R, S)
        scores = scores + ext_mask
        scores = scores - jnp.max(scores, axis=-1, keepdims=True)
        e = jnp.exp(scores)
        inv_den = pl.reciprocal(jnp.sum(e, axis=-1, keepdims=True), approx=True)
        ctx_parts.append(jnp.dot(e * inv_den, v_all[:, sl],
                                 preferred_element_type=jnp.float32))      # (R, dh)
    ctx = jnp.concatenate(ctx_parts, axis=-1)                              # (R, H)
    res = jnp.dot(ctx, w_o, preferred_element_type=jnp.float32) + b_o + resid
    msq = jnp.mean(res * res, axis=-1, keepdims=True)
    return ns * (res * lax.rsqrt(msq + EPS))                               # RMSNorm


def _pointer_ffn(x, w1, b1, w2_wide, b2_wide, cs_rows):
    """Pointer FFN with RoPE rotation + sqrt(pointer_scale) folded into w2_wide/b2_wide:
    full = [y*s | rot(y*s)]; applying RoPE is one multiply by [cos|sin] plus a lane-slice add."""
    mid = _gelu_exact(jnp.dot(x, w1, preferred_element_type=jnp.float32) + b1)      # (R, INTER)
    full = jnp.dot(mid, w2_wide, preferred_element_type=jnp.float32) + b2_wide      # (R, 2*PTR_DIM)
    full = full * cs_rows
    return full[:, :PTR_DIM] + full[:, PTR_DIM:2 * PTR_DIM]                         # (R, PTR_DIM)


# ===================== fused Pallas kernel =====================

def fused_ser_pointer_kernel(hs_ref, mask_ref, w_qkv_ref, w32_ref, w2p_ref,
                             bias_ref, cs_ref, logits_ref, qkv1_scr, kw_scr):
    """Grid = (batch, query-tile).  At q-tile 0: fused full-S QKV matmul, branch-2 attention +
    FFN2 -> kw cached in VMEM scratch (plus q1/k1/v1 cached).  Every tile: branch-1 attention
    for its TQ query rows, FFN1 -> qw, and the per-head bilinear logits with pad/tril masks."""
    q_idx = pl.program_id(1)
    S = hs_ref.shape[1]
    TQ = logits_ref.shape[2]
    if TQ == S:
        row0 = 0                                  # single tile: fully static addressing
    else:
        row0 = pl.multiple_of(q_idx * TQ, 8)      # _choose_tq guarantees TQ % 8 == 0 here

    m = mask_ref[0]                               # (1, S) float, 1 = keep
    ext_mask = (1.0 - m) * -10000.0               # additive key mask for both attention branches

    # Static slices of the packed constant slabs.
    b_qkv = bias_ref[:, _B_QKV[0]:_B_QKV[1]]
    b_o1 = bias_ref[:, _B_O1[0]:_B_O1[1]]
    b_o2 = bias_ref[:, _B_O2[0]:_B_O2[1]]
    ns1 = bias_ref[:, _NS1[0]:_NS1[1]]
    ns2 = bias_ref[:, _NS2[0]:_NS2[1]]
    b1a = bias_ref[:, _B1A[0]:_B1A[1]]
    b1b = bias_ref[:, _B1B[0]:_B1B[1]]
    b2a = bias_ref[:, _B2A[0]:_B2A[1]]
    b2b = bias_ref[:, _B2B[0]:_B2B[1]]
    w_o1 = w32_ref[:, _W_O1[0]:_W_O1[1]]
    w_o2 = w32_ref[:, _W_O2[0]:_W_O2[1]]
    w1a = w32_ref[:, _W_1A[0]:_W_1A[1]]
    w1b = w32_ref[:, _W_1B[0]:_W_1B[1]]
    w2a = w2p_ref[:, _W_2A[0]:_W_2A[1]]
    w2b = w2p_ref[:, _W_2B[0]:_W_2B[1]]

    # ---- once per batch row: full-S QKV, branch-2 attention, FFN2 -> kw (persist in scratch)
    @pl.when(q_idx == 0)
    def _():
        hs_full = hs_ref[0]                                           # (S, H)
        if POINTER_WITH_SCA:
            qkv = jnp.dot(hs_full, w_qkv_ref[...],
                          preferred_element_type=jnp.float32) + b_qkv  # (S, 6H)
            qkv1_scr[...] = qkv[:, 0:3 * HIDDEN]                       # q1|k1|v1 reused by tiles
            out2 = _sca_branch(qkv[:, 3 * HIDDEN:4 * HIDDEN],
                               qkv[:, 4 * HIDDEN:5 * HIDDEN],
                               qkv[:, 5 * HIDDEN:6 * HIDDEN],
                               hs_full, w_o2, b_o2, ns2, ext_mask)     # (S, H)
        else:
            out2 = hs_full
        kw_scr[...] = _pointer_ffn(out2, w1b, b1b, w2b, b2b, cs_ref[...])   # (S, PTR_DIM)

    # ---- every query tile: branch-1 attention for TQ rows, FFN1 -> qw, then logits
    hs_tile = hs_ref[0, pl.ds(row0, TQ), :]                            # (TQ, H)
    if POINTER_WITH_SCA:
        q1 = qkv1_scr[pl.ds(row0, TQ), 0:HIDDEN]
        k1 = qkv1_scr[:, HIDDEN:2 * HIDDEN]
        v1 = qkv1_scr[:, 2 * HIDDEN:3 * HIDDEN]
        out1 = _sca_branch(q1, k1, v1, hs_tile, w_o1, b_o1, ns1, ext_mask)
    else:
        out1 = hs_tile
    qw = _pointer_ffn(out1, w1a, b1a, w2a, b2a, cs_ref[pl.ds(row0, TQ), :])  # (TQ, PTR_DIM)
    kw = kw_scr[...]                                                         # (S, PTR_DIM)

    # Combined additive pad/tril mask, hoisted out of the pointer-head loop.
    rows = lax.broadcasted_iota(jnp.int32, (TQ, S), 0) + row0
    cols = lax.broadcasted_iota(jnp.int32, (TQ, S), 1)
    neg_add = -(1.0 - m) * INF                                               # (1, S)
    if TRIL_MASK:
        neg_add = neg_add - (rows > cols).astype(jnp.float32) * INF          # (TQ, S)

    # TODO(synk): for S >= ~128 pack the 4 head logits into one (TQ,32)@(32,4S) block-diag
    #             matmul and store one lane-dense (TQ, 4S) slab.
    for h in range(PTR_HEADS):
        sl = slice(h * PTR_HEAD, (h + 1) * PTR_HEAD)
        lg = lax.dot_general(qw[:, sl], kw[:, sl], (((1,), (1,)), ((), ())),
                             preferred_element_type=jnp.float32)             # (TQ, S)
        logits_ref[0, h, :, :] = lg * m + neg_add


# ===================== wrapper =====================

def _choose_tq(S):
    """Query-row tile size: full S for small sequences, otherwise the largest multiple of 8
    dividing S (capped) so the double-buffered (PTR_HEADS, TQ, S) output block stays well inside
    v5e's 16 MiB scoped default and v7x's 64 MiB physical VMEM."""
    if S <= 128:
        return S
    cap = 256 if S <= 2048 else 128
    for tq in range(cap, 7, -8):
        if S % tq == 0:
            return tq
    return S


def _const_spec(arr):
    nd = arr.ndim
    return pl.BlockSpec(arr.shape, lambda b, q, nd=nd: (0,) * nd)


def ser_pointer_forward(hidden_states, bbox, attention_mask, packed):
    """Full SERPointer.forward (pointer_sca_layer=0 => eht_pointer only).  bbox accepted but
    unused because the 2D RoPE is constructed with indices_x=indices_y=None (sca_rope=0)."""
    del bbox
    B, S, H = hidden_states.shape
    TQ = _choose_tq(S)
    assert S % TQ == 0
    NQ = S // TQ
    mask3 = attention_mask.astype(jnp.float32).reshape(B, 1, S)
    consts = [packed[k] for k in ("w_qkv", "w32", "w2p", "bias", "cs")]

    in_specs = ([pl.BlockSpec((1, S, H), lambda b, q: (b, 0, 0)),
                 pl.BlockSpec((1, 1, S), lambda b, q: (b, 0, 0))]
                + [_const_spec(a) for a in consts])

    # Rough f32 VMEM footprint: double-buffered in/out blocks + resident consts + scratch.
    est = 4 * (2 * (PTR_HEADS * TQ * S + S * H + S)
               + 2 * sum(int(np.prod(a.shape)) for a in consts)
               + S * (3 * HIDDEN + PTR_DIM))
    vmem_limit = None if est <= 24 * 2 ** 20 else min(2 * est, 64 * 2 ** 20)

    # TODO(synk): when B == 1 on v7x, split the q-tile range across the two TensorCores
    #             (explicit core split) instead of relying on the batch axis for megacore work.
    return pl.pallas_call(
        fused_ser_pointer_kernel,
        out_shape=jax.ShapeDtypeStruct((B, PTR_HEADS, S, S), jnp.float32),
        grid=(B, NQ),
        in_specs=in_specs,
        out_specs=pl.BlockSpec((1, PTR_HEADS, TQ, S), lambda b, q: (b, 0, q, 0)),
        scratch_shapes=[pltpu.VMEM((S, 3 * HIDDEN), jnp.float32),   # q1|k1|v1 cache
                        pltpu.VMEM((S, PTR_DIM), jnp.float32)],     # kw cache
        compiler_params=pltpu.CompilerParams(
            dimension_semantics=("parallel", "arbitrary"),
            vmem_limit_bytes=vmem_limit),
    )(hidden_states, mask3, *consts)


# ===================== params / host-side packing =====================

def _rope_tables(S, head_size, heads):
    inv = (10000.0 ** (-2.0 * np.arange(head_size // 2) / head_size)).astype(np.float32)
    ang = np.arange(S, dtype=np.float32)[:, None] * inv[None, :]          # (S, d/2)
    sin = np.repeat(np.sin(ang), 2, axis=-1)                              # [s0,s0,s1,s1,...]
    cos = np.repeat(np.cos(ang), 2, axis=-1)
    sin_full = np.tile(sin, (1, heads))                                   # (S, heads*d)
    cos_full = np.tile(cos, (1, heads))
    P = heads * head_size
    rot = np.zeros((P, P), dtype=np.float32)
    for i in range(P // 2):
        rot[2 * i + 1, 2 * i] = -1.0        # (x@rot)[2i]   = -x[2i+1]
        rot[2 * i, 2 * i + 1] = 1.0         # (x@rot)[2i+1] =  x[2i]
    return jnp.asarray(sin_full), jnp.asarray(cos_full), jnp.asarray(rot)


def init_params(key, S):
    def lin(k, din, dout):
        return (jax.random.normal(k, (din, dout), jnp.float32) * INIT_STD,
                jnp.zeros((1, dout), jnp.float32))

    def attn_params(k):
        kq, kk, kv, ko = jax.random.split(k, 4)
        wq, bq = lin(kq, HIDDEN, HIDDEN)
        wk, bk = lin(kk, HIDDEN, HIDDEN)
        wv, bv = lin(kv, HIDDEN, HIDDEN)
        wo, bo = lin(ko, HIDDEN, HIDDEN)
        ns = jnp.ones((1, HIDDEN), jnp.float32)        # RMSNorm scale
        return [wq, bq, wk, bk, wv, bv, wo, bo, ns]

    def ffn_params(k):
        k1, k2 = jax.random.split(k)
        w1, b1 = lin(k1, HIDDEN, INTER)
        w2, b2 = lin(k2, INTER, PTR_DIM)
        return [w1, b1, w2, b2]

    ka1, ka2, kf1, kf2 = jax.random.split(key, 4)
    sin_f, cos_f, rot = _rope_tables(S, PTR_HEAD, PTR_HEADS)
    return {
        "attn1": attn_params(ka1), "attn2": attn_params(ka2),
        "ffn1": ffn_params(kf1), "ffn2": ffn_params(kf2),
        "rope_sin": sin_f, "rope_cos": cos_f, "rope_rot": rot,
    }


def pack_params(params, S):
    """Exact host-side packing / algebraic folding for the fused kernel (all folds are linear).
    Layout order must match the _B_* / _W_* lane-offset constants above."""
    wq1, bq1, wk1, bk1, wv1, bv1, wo1, bo1, ns1 = params["attn1"]
    wq2, bq2, wk2, bk2, wv2, bv2, wo2, bo2, ns2 = params["attn2"]
    w1a, b1a, w2a, b2a = params["ffn1"]
    w1b, b1b, w2b, b2b = params["ffn2"]
    sin_f, cos_f, rot = params["rope_sin"], params["rope_cos"], params["rope_rot"]

    inv_dh = 1.0 / math.sqrt(ATTN_HEAD)                       # folded into Q of both branches
    w_qkv = jnp.concatenate([wq1 * inv_dh, wk1, wv1, wq2 * inv_dh, wk2, wv2], axis=1)  # (H, 6H)
    b_qkv = jnp.concatenate([bq1 * inv_dh, bk1, bv1, bq2 * inv_dh, bk2, bv2], axis=1)  # (1, 6H)

    s = math.sqrt(SCALE)                                      # sqrt(scale) into both q and k

    def widen(w2x, b2x):                                      # fold RoPE rotation + scale
        w2s, b2s = w2x * s, b2x * s
        return (jnp.concatenate([w2s, w2s @ rot], axis=1),
                jnp.concatenate([b2s, b2s @ rot], axis=1))

    w2a_wide, b2a_wide = widen(w2a, b2a)                      # (INTER, 2*PTR_DIM)
    w2b_wide, b2b_wide = widen(w2b, b2b)

    w32 = jnp.concatenate([wo1, wo2, w1a, w1b], axis=1)       # (32, 192)
    w2p = jnp.concatenate([w2a_wide, w2b_wide], axis=1)       # (64, 128)
    bias = jnp.concatenate([b_qkv, bo1, bo2, ns1, ns2, b1a, b1b,
                            b2a_wide, b2b_wide], axis=1)      # (1, 576)

    if POINTER_ROPE:
        cs = jnp.concatenate([cos_f, sin_f], axis=1)          # (S, 2*PTR_DIM)
    else:
        cs = jnp.concatenate([jnp.ones_like(cos_f), jnp.zeros_like(sin_f)], axis=1)

    return {"w_qkv": w_qkv, "w32": w32, "w2p": w2p, "bias": bias, "cs": cs}


# ===================== pure-JAX reference (sanity check, uses raw params) =====================

def reference_forward(hs, attention_mask, params):
    B, S, H = hs.shape
    mask = attention_mask.astype(jnp.float32)

    def attn(x, p):
        wq, bq, wk, bk, wv, bv, wo, bo, ns = p
        q, k, v = x @ wq + bq, x @ wk + bk, x @ wv + bv

        def split(t):
            return t.reshape(B, S, NUM_ATTN_HEADS, ATTN_HEAD).transpose(0, 2, 1, 3)

        qh, kh, vh = split(q), split(k), split(v)
        scores = jnp.einsum('bhmd,bhnd->bhmn', qh / math.sqrt(ATTN_HEAD), kh)
        scores = scores + (1.0 - mask.reshape(B, 1, 1, S)) * -10000.0
        probs = jax.nn.softmax(scores, axis=-1)
        ctx = jnp.einsum('bhmn,bhnd->bhmd', probs, vh).transpose(0, 2, 1, 3).reshape(B, S, H)
        res = ctx @ wo + bo + x
        return ns * (res * lax.rsqrt(jnp.mean(res * res, -1, keepdims=True) + EPS))

    o1 = attn(hs, params["attn1"]) if POINTER_WITH_SCA else hs
    o2 = attn(hs, params["attn2"]) if POINTER_WITH_SCA else hs

    def ffn(x, p):
        w1, b1, w2, b2 = p
        return _gelu_exact(x @ w1 + b1) @ w2 + b2

    qw = ffn(o1, params["ffn1"])
    kw = ffn(o2, params["ffn2"])
    if POINTER_ROPE:
        qw = qw * params["rope_cos"] + (qw @ params["rope_rot"]) * params["rope_sin"]
        kw = kw * params["rope_cos"] + (kw @ params["rope_rot"]) * params["rope_sin"]
    qw4 = qw.reshape(B, S, PTR_HEADS, PTR_HEAD)
    kw4 = kw.reshape(B, S, PTR_HEADS, PTR_HEAD)
    logits = jnp.einsum('bmhd,bnhd->bhmn', qw4, kw4) * SCALE
    pad = mask.reshape(B, 1, 1, S)
    logits = logits * pad - (1.0 - pad) * INF
    if TRIL_MASK:
        logits = logits - jnp.tril(jnp.ones((S, S), jnp.float32), -1) * INF
    return logits


# ===================== main =====================

if __name__ == "__main__":
    B, S = 2, 8
    key = jax.random.PRNGKey(0)
    k_hs, k_bbox, k_p = jax.random.split(key, 3)

    hidden_states = jax.random.normal(k_hs, (B, S, HIDDEN), jnp.float32)
    # bbox is unused: sca_rope=0 => rope2d indices are None => 2D RoPE is the identity.
    bbox = jax.random.randint(k_bbox, (B, S, 4), 0, 1000).astype(jnp.float32)
    attention_mask = jnp.ones((B, S), jnp.float32).at[0, -2:].set(0.0)

    params = init_params(k_p, S)
    packed = pack_params(params, S)

    logits = ser_pointer_forward(hidden_states, bbox, attention_mask, packed)
    jax.block_until_ready(logits)

    ref = reference_forward(hidden_states, attention_mask, params)
    np.testing.assert_allclose(np.asarray(logits), np.asarray(ref), rtol=2e-2, atol=2e-2)

    print("KERNEL_OK")
</pallas_src>

<mosaic_0001>
module attributes {stable_mosaic.version = 11 : i64} {
  func.func @fused_ser_pointer_kernel(%arg0: i32, %arg1: i32, %arg2: memref<1x8x32xf32, #tpu.memory_space<vmem>>, %arg3: memref<1x1x8xf32, #tpu.memory_space<vmem>>, %arg4: memref<32x192xf32, #tpu.memory_space<vmem>>, %arg5: memref<32x192xf32, #tpu.memory_space<vmem>>, %arg6: memref<64x128xf32, #tpu.memory_space<vmem>>, %arg7: memref<1x576xf32, #tpu.memory_space<vmem>>, %arg8: memref<8x64xf32, #tpu.memory_space<vmem>>, %arg9: memref<1x4x8x8xf32, #tpu.memory_space<vmem>>, %arg10: memref<8x96xf32, #tpu.memory_space<vmem>>, %arg11: memref<8x32xf32, #tpu.memory_space<vmem>>) attributes {dimension_semantics = [#tpu.dimension_semantics<parallel>, #tpu.dimension_semantics<arbitrary>], iteration_bounds = array<i64: 2, 1>, scalar_prefetch = 0 : i64, scratch_operands = 2 : i64, tpu.core_type = #tpu.core_type<tc>, window_params = [{transform_indices = @transform_0, window_bounds = array<i64: 1, 8, 32>}, {transform_indices = @transform_1, window_bounds = array<i64: 1, 1, 8>}, {pipeline_mode = #tpu.pipeline_mode<synchronous>, transform_indices = @transform_2, window_bounds = array<i64: 32, 192>}, {pipeline_mode = #tpu.pipeline_mode<synchronous>, transform_indices = @transform_3, window_bounds = array<i64: 32, 192>}, {pipeline_mode = #tpu.pipeline_mode<synchronous>, transform_indices = @transform_4, window_bounds = array<i64: 64, 128>}, {pipeline_mode = #tpu.pipeline_mode<synchronous>, transform_indices = @transform_5, window_bounds = array<i64: 1, 576>}, {pipeline_mode = #tpu.pipeline_mode<synchronous>, transform_indices = @transform_6, window_bounds = array<i64: 8, 64>}, {transform_indices = @transform_7, window_bounds = array<i64: 1, 4, 8, 8>}]} {
    %c0 = arith.constant 0 : index
    %c0_0 = arith.constant 0 : index
    %c0_1 = arith.constant 0 : index
    %0 = vector.load %arg3[%c0, %c0_0, %c0_1] : memref<1x1x8xf32, #tpu.memory_space<vmem>>, vector<1x1x8xf32>
    %1 = vector.shape_cast %0 : vector<1x1x8xf32> to vector<1x8xf32>
    %cst = arith.constant 1.000000e+00 : f32
    %2 = vector.broadcast %cst : f32 to vector<1x8xf32>
    %3 = arith.subf %2, %1 : vector<1x8xf32>
    %cst_2 = arith.constant -1.000000e+04 : f32
    %4 = vector.broadcast %cst_2 : f32 to vector<1x8xf32>
    %5 = arith.mulf %3, %4 : vector<1x8xf32>
    %c0_3 = arith.constant 0 : index
    %c0_4 = arith.constant 0 : index
    %6 = vector.load %arg7[%c0_3, %c0_4] : memref<1x576xf32, #tpu.memory_space<vmem>>, vector<1x192xf32>
    %c0_5 = arith.constant 0 : index
    %c192 = arith.constant 192 : index
    %7 = vector.load %arg7[%c0_5, %c192] : memref<1x576xf32, #tpu.memory_space<vmem>>, vector<1x32xf32>
    %c0_6 = arith.constant 0 : index
    %c224 = arith.constant 224 : index
    %8 = vector.load %arg7[%c0_6, %c224] : memref<1x576xf32, #tpu.memory_space<vmem>>, vector<1x32xf32>
    %c0_7 = arith.constant 0 : index
    %c256 = arith.constant 256 : index
    %9 = vector.load %arg7[%c0_7, %c256] : memref<1x576xf32, #tpu.memory_space<vmem>>, vector<1x32xf32>
    %c0_8 = arith.constant 0 : index
    %c288 = arith.constant 288 : index
    %10 = vector.load %arg7[%c0_8, %c288] : memref<1x576xf32, #tpu.memory_space<vmem>>, vector<1x32xf32>
    %c0_9 = arith.constant 0 : index
    %c320 = arith.constant 320 : index
    %11 = vector.load %arg7[%c0_9, %c320] : memref<1x576xf32, #tpu.memory_space<vmem>>, vector<1x64xf32>
    %c0_10 = arith.constant 0 : index
    %c384 = arith.constant 384 : index
    %12 = vector.load %arg7[%c0_10, %c384] : memref<1x576xf32, #tpu.memory_space<vmem>>, vector<1x64xf32>
    %c0_11 = arith.constant 0 : index
    %c448 = arith.constant 448 : index
    %13 = vector.load %arg7[%c0_11, %c448] : memref<1x576xf32, #tpu.memory_space<vmem>>, vector<1x64xf32>
    %c0_12 = arith.constant 0 : index
    %c512 = arith.constant 512 : index
    %14 = vector.load %arg7[%c0_12, %c512] : memref<1x576xf32, #tpu.memory_space<vmem>>, vector<1x64xf32>
    %c0_13 = arith.constant 0 : index
    %c0_14 = arith.constant 0 : index
    %15 = vector.load %arg5[%c0_13, %c0_14] : memref<32x192xf32, #tpu.memory_space<vmem>>, vector<32x32xf32>
    %c0_15 = arith.constant 0 : index
    %c32 = arith.constant 32 : index
    %16 = vector.load %arg5[%c0_15, %c32] : memref<32x192xf32, #tpu.memory_space<vmem>>, vector<32x32xf32>
    %c0_16 = arith.constant 0 : index
    %c64 = arith.constant 64 : index
    %17 = vector.load %arg5[%c0_16, %c64] : memref<32x192xf32, #tpu.memory_space<vmem>>, vector<32x64xf32>
    %c0_17 = arith.constant 0 : index
    %c128 = arith.constant 128 : index
    %18 = vector.load %arg5[%c0_17, %c128] : memref<32x192xf32, #tpu.memory_space<vmem>>, vector<32x64xf32>
    %c0_18 = arith.constant 0 : index
    %c0_19 = arith.constant 0 : index
    %19 = vector.load %arg6[%c0_18, %c0_19] : memref<64x128xf32, #tpu.memory_space<vmem>>, vector<64x64xf32>
    %c0_20 = arith.constant 0 : index
    %c64_21 = arith.constant 64 : index
    %20 = vector.load %arg6[%c0_20, %c64_21] : memref<64x128xf32, #tpu.memory_space<vmem>>, vector<64x64xf32>
    %c0_i32 = arith.constant 0 : i32
    %21 = arith.cmpi eq, %arg1, %c0_i32 : i32
    %22 = arith.extui %21 : i1 to i32
    %c0_i32_22 = arith.constant 0 : i32
    %23 = arith.cmpi ne, %22, %c0_i32_22 : i32
    scf.if %23 {
      %c0_83 = arith.constant 0 : index
      %c0_84 = arith.constant 0 : index
      %c0_85 = arith.constant 0 : index
      %187 = vector.load %arg2[%c0_83, %c0_84, %c0_85] : memref<1x8x32xf32, #tpu.memory_space<vmem>>, vector<1x8x32xf32>
      %188 = vector.shape_cast %187 : vector<1x8x32xf32> to vector<8x32xf32>
      %c0_86 = arith.constant 0 : index
      %c0_87 = arith.constant 0 : index
      %189 = vector.load %arg4[%c0_86, %c0_87] : memref<32x192xf32, #tpu.memory_space<vmem>>, vector<32x192xf32>
      %cst_88 = arith.constant dense<0.000000e+00> : vector<8x192xf32>
      %190 = tpu.matmul %188, %189, %cst_88 {dimension_numbers = #tpu.dot_dimension_numbers<[1], [0], [0], [1], [0, 0, 1, 1], [], []>} : vector<8x32xf32>, vector<32x192xf32>, vector<8x192xf32> -> vector<8x192xf32>
      %191 = vector.broadcast %6 : vector<1x192xf32> to vector<8x192xf32>
      %192 = arith.addf %190, %191 : vector<8x192xf32>
      %193 = vector.extract_strided_slice %192 {offsets = [0, 0], sizes = [8, 96], strides = [1, 1]} : vector<8x192xf32> to vector<8x96xf32>
      %c0_89 = arith.constant 0 : index
      %c0_90 = arith.constant 0 : index
      %194 = vector.load %arg10[%c0_89, %c0_90] : memref<8x96xf32, #tpu.memory_space<vmem>>, vector<8x96xf32>
      tpu.vector_store %arg10[%c0_89, %c0_90], %193 {strides = array<i32>} : memref<8x96xf32, #tpu.memory_space<vmem>>, vector<8x96xf32>,
      %195 = vector.extract_strided_slice %192 {offsets = [0, 96], sizes = [8, 32], strides = [1, 1]} : vector<8x192xf32> to vector<8x32xf32>
      %196 = vector.extract_strided_slice %192 {offsets = [0, 128], sizes = [8, 32], strides = [1, 1]} : vector<8x192xf32> to vector<8x32xf32>
      %197 = vector.extract_strided_slice %192 {offsets = [0, 160], sizes = [8, 32], strides = [1, 1]} : vector<8x192xf32> to vector<8x32xf32>
      %198 = vector.extract_strided_slice %195 {offsets = [0, 0], sizes = [8, 8], strides = [1, 1]} : vector<8x32xf32> to vector<8x8xf32>
      %199 = vector.extract_strided_slice %196 {offsets = [0, 0], sizes = [8, 8], strides = [1, 1]} : vector<8x32xf32> to vector<8x8xf32>
      %cst_91 = arith.constant dense<0.000000e+00> : vector<8x8xf32>
      %200 = tpu.matmul %198, %199, %cst_91 {dimension_numbers = #tpu.dot_dimension_numbers<[1], [1], [0], [0], [0, 0, 1, 0], [], []>} : vector<8x8xf32>, vector<8x8xf32>, vector<8x8xf32> -> vector<8x8xf32>
      %201 = vector.broadcast %5 : vector<1x8xf32> to vector<8x8xf32>
      %202 = arith.addf %200, %201 : vector<8x8xf32>
      %cst_92 = arith.constant dense<0xFF800000> : vector<8xf32>
      %203 = vector.multi_reduction <maximumf>, %202, %cst_92 [1] : vector<8x8xf32> to vector<8xf32>
      %204 = vector.shape_cast %203 : vector<8xf32> to vector<8x1xf32>
      %205 = vector.broadcast %204 : vector<8x1xf32> to vector<8x8xf32>
      %206 = arith.subf %202, %205 : vector<8x8xf32>
      %207 = math.exp %206 : vector<8x8xf32>
      %cst_93 = arith.constant dense<0.000000e+00> : vector<8xf32>
      %208 = vector.multi_reduction <add>, %207, %cst_93 [1] : vector<8x8xf32> to vector<8xf32>
      %209 = vector.shape_cast %208 : vector<8xf32> to vector<8x1xf32>
      %210 = tpu.reciprocal %209 {approx = true} : vector<8x1xf32> -> vector<8x1xf32>
      %211 = vector.broadcast %210 : vector<8x1xf32> to vector<8x8xf32>
      %212 = arith.mulf %207, %211 : vector<8x8xf32>
      %213 = vector.extract_strided_slice %197 {offsets = [0, 0], sizes = [8, 8], strides = [1, 1]} : vector<8x32xf32> to vector<8x8xf32>
      %cst_94 = arith.constant dense<0.000000e+00> : vector<8x8xf32>
      %214 = tpu.matmul %212, %213, %cst_94 {dimension_numbers = #tpu.dot_dimension_numbers<[1], [0], [0], [1], [0, 0, 1, 1], [], []>} : vector<8x8xf32>, vector<8x8xf32>, vector<8x8xf32> -> vector<8x8xf32>
      %215 = vector.extract_strided_slice %195 {offsets = [0, 8], sizes = [8, 8], strides = [1, 1]} : vector<8x32xf32> to vector<8x8xf32>
      %216 = vector.extract_strided_slice %196 {offsets = [0, 8], sizes = [8, 8], strides = [1, 1]} : vector<8x32xf32> to vector<8x8xf32>
      %cst_95 = arith.constant dense<0.000000e+00> : vector<8x8xf32>
      %217 = tpu.matmul %215, %216, %cst_95 {dimension_numbers = #tpu.dot_dimension_numbers<[1], [1], [0], [0], [0, 0, 1, 0], [], []>} : vector<8x8xf32>, vector<8x8xf32>, vector<8x8xf32> -> vector<8x8xf32>
      %218 = vector.broadcast %5 : vector<1x8xf32> to vector<8x8xf32>
      %219 = arith.addf %217, %218 : vector<8x8xf32>
      %cst_96 = arith.constant dense<0xFF800000> : vector<8xf32>
      %220 = vector.multi_reduction <maximumf>, %219, %cst_96 [1] : vector<8x8xf32> to vector<8xf32>
      %221 = vector.shape_cast %220 : vector<8xf32> to vector<8x1xf32>
      %222 = vector.broadcast %221 : vector<8x1xf32> to vector<8x8xf32>
      %223 = arith.subf %219, %222 : vector<8x8xf32>
      %224 = math.exp %223 : vector<8x8xf32>
      %cst_97 = arith.constant dense<0.000000e+00> : vector<8xf32>
      %225 = vector.multi_reduction <add>, %224, %cst_97 [1] : vector<8x8xf32> to vector<8xf32>
      %226 = vector.shape_cast %225 : vector<8xf32> to vector<8x1xf32>
      %227 = tpu.reciprocal %226 {approx = true} : vector<8x1xf32> -> vector<8x1xf32>
      %228 = vector.broadcast %227 : vector<8x1xf32> to vector<8x8xf32>
      %229 = arith.mulf %224, %228 : vector<8x8xf32>
      %230 = vector.extract_strided_slice %197 {offsets = [0, 8], sizes = [8, 8], strides = [1, 1]} : vector<8x32xf32> to vector<8x8xf32>
      %cst_98 = arith.constant dense<0.000000e+00> : vector<8x8xf32>
      %231 = tpu.matmul %229, %230, %cst_98 {dimension_numbers = #tpu.dot_dimension_numbers<[1], [0], [0], [1], [0, 0, 1, 1], [], []>} : vector<8x8xf32>, vector<8x8xf32>, vector<8x8xf32> -> vector<8x8xf32>
      %232 = vector.extract_strided_slice %195 {offsets = [0, 16], sizes = [8, 8], strides = [1, 1]} : vector<8x32xf32> to vector<8x8xf32>
      %233 = vector.extract_strided_slice %196 {offsets = [0, 16], sizes = [8, 8], strides = [1, 1]} : vector<8x32xf32> to vector<8x8xf32>
      %cst_99 = arith.constant dense<0.000000e+00> : vector<8x8xf32>
      %234 = tpu.matmul %232, %233, %cst_99 {dimension_numbers = #tpu.dot_dimension_numbers<[1], [1], [0], [0], [0, 0, 1, 0], [], []>} : vector<8x8xf32>, vector<8x8xf32>, vector<8x8xf32> -> vector<8x8xf32>
      %235 = vector.broadcast %5 : vector<1x8xf32> to vector<8x8xf32>
      %236 = arith.addf %234, %235 : vector<8x8xf32>
      %cst_100 = arith.constant dense<0xFF800000> : vector<8xf32>
      %237 = vector.multi_reduction <maximumf>, %236, %cst_100 [1] : vector<8x8xf32> to vector<8xf32>
      %238 = vector.shape_cast %237 : vector<8xf32> to vector<8x1xf32>
      %239 = vector.broadcast %238 : vector<8x1xf32> to vector<8x8xf32>
      %240 = arith.subf %236, %239 : vector<8x8xf32>
      %241 = math.exp %240 : vector<8x8xf32>
      %cst_101 = arith.constant dense<0.000000e+00> : vector<8xf32>
      %242 = vector.multi_reduction <add>, %241, %cst_101 [1] : vector<8x8xf32> to vector<8xf32>
      %243 = vector.shape_cast %242 : vector<8xf32> to vector<8x1xf32>
      %244 = tpu.reciprocal %243 {approx = true} : vector<8x1xf32> -> vector<8x1xf32>
      %245 = vector.broadcast %244 : vector<8x1xf32> to vector<8x8xf32>
      %246 = arith.mulf %241, %245 : vector<8x8xf32>
      %247 = vector.extract_strided_slice %197 {offsets = [0, 16], sizes = [8, 8], strides = [1, 1]} : vector<8x32xf32> to vector<8x8xf32>
      %cst_102 = arith.constant dense<0.000000e+00> : vector<8x8xf32>
      %248 = tpu.matmul %246, %247, %cst_102 {dimension_numbers = #tpu.dot_dimension_numbers<[1], [0], [0], [1], [0, 0, 1, 1], [], []>} : vector<8x8xf32>, vector<8x8xf32>, vector<8x8xf32> -> vector<8x8xf32>
      %249 = vector.extract_strided_slice %195 {offsets = [0, 24], sizes = [8, 8], strides = [1, 1]} : vector<8x32xf32> to vector<8x8xf32>
      %250 = vector.extract_strided_slice %196 {offsets = [0, 24], sizes = [8, 8], strides = [1, 1]} : vector<8x32xf32> to vector<8x8xf32>
      %cst_103 = arith.constant dense<0.000000e+00> : vector<8x8xf32>
      %251 = tpu.matmul %249, %250, %cst_103 {dimension_numbers = #tpu.dot_dimension_numbers<[1], [1], [0], [0], [0, 0, 1, 0], [], []>} : vector<8x8xf32>, vector<8x8xf32>, vector<8x8xf32> -> vector<8x8xf32>
      %252 = vector.broadcast %5 : vector<1x8xf32> to vector<8x8xf32>
      %253 = arith.addf %251, %252 : vector<8x8xf32>
      %cst_104 = arith.constant dense<0xFF800000> : vector<8xf32>
      %254 = vector.multi_reduction <maximumf>, %253, %cst_104 [1] : vector<8x8xf32> to vector<8xf32>
      %255 = vector.shape_cast %254 : vector<8xf32> to vector<8x1xf32>
      %256 = vector.broadcast %255 : vector<8x1xf32> to vector<8x8xf32>
      %257 = arith.subf %253, %256 : vector<8x8xf32>
      %258 = math.exp %257 : vector<8x8xf32>
      %cst_105 = arith.constant dense<0.000000e+00> : vector<8xf32>
      %259 = vector.multi_reduction <add>, %258, %cst_105 [1] : vector<8x8xf32> to vector<8xf32>
      %260 = vector.shape_cast %259 : vector<8xf32> to vector<8x1xf32>
      %261 = tpu.reciprocal %260 {approx = true} : vector<8x1xf32> -> vector<8x1xf32>
      %262 = vector.broadcast %261 : vector<8x1xf32> to vector<8x8xf32>
      %263 = arith.mulf %258, %262 : vector<8x8xf32>
      %264 = vector.extract_strided_slice %197 {offsets = [0, 24], sizes = [8, 8], strides = [1, 1]} : vector<8x32xf32> to vector<8x8xf32>
      %cst_106 = arith.constant dense<0.000000e+00> : vector<8x8xf32>
      %265 = tpu.matmul %263, %264, %cst_106 {dimension_numbers = #tpu.dot_dimension_numbers<[1], [0], [0], [1], [0, 0, 1, 1], [], []>} : vector<8x8xf32>, vector<8x8xf32>, vector<8x8xf32> -> vector<8x8xf32>
      %266 = tpu.concatenate %214, %231, %248, %265 in 1 : vector<8x8xf32>, vector<8x8xf32>, vector<8x8xf32>, vector<8x8xf32> -> vector<8x32xf32>
      %cst_107 = arith.constant dense<0.000000e+00> : vector<8x32xf32>
      %267 = tpu.matmul %266, %16, %cst_107 {dimension_numbers = #tpu.dot_dimension_numbers<[1], [0], [0], [1], [0, 0, 1, 1], [], []>} : vector<8x32xf32>, vector<32x32xf32>, vector<8x32xf32> -> vector<8x32xf32>
      %268 = vector.broadcast %8 : vector<1x32xf32> to vector<8x32xf32>
      %269 = arith.addf %267, %268 : vector<8x32xf32>
      %270 = arith.addf %269, %188 : vector<8x32xf32>
      %271 = arith.mulf %270, %270 : vector<8x32xf32>
      %cst_108 = arith.constant dense<0.000000e+00> : vector<8xf32>
      %272 = vector.multi_reduction <add>, %271, %cst_108 [1] : vector<8x32xf32> to vector<8xf32>
      %273 = vector.shape_cast %272 : vector<8xf32> to vector<8x1xf32>
      %cst_109 = arith.constant 3.200000e+01 : f32
      %274 = vector.broadcast %cst_109 : f32 to vector<8x1xf32>
      %275 = arith.divf %273, %274 : vector<8x1xf32>
      %cst_110 = arith.constant 9.99999997E-7 : f32
      %276 = vector.broadcast %cst_110 : f32 to vector<8x1xf32>
      %277 = arith.addf %275, %276 : vector<8x1xf32>
      %278 = math.rsqrt %277 : vector<8x1xf32>
      %279 = vector.broadcast %278 : vector<8x1xf32> to vector<8x32xf32>
      %280 = arith.mulf %270, %279 : vector<8x32xf32>
      %281 = vector.broadcast %10 : vector<1x32xf32> to vector<8x32xf32>
      %282 = arith.mulf %281, %280 : vector<8x32xf32>
      %c0_111 = arith.constant 0 : index
      %c0_112 = arith.constant 0 : index
      %283 = vector.load %arg8[%c0_111, %c0_112] : memref<8x64xf32, #tpu.memory_space<vmem>>, vector<8x64xf32>
      %cst_113 = arith.constant dense<0.000000e+00> : vector<8x64xf32>
      %284 = tpu.matmul %282, %18, %cst_113 {dimension_numbers = #tpu.dot_dimension_numbers<[1], [0], [0], [1], [0, 0, 1, 1], [], []>} : vector<8x32xf32>, vector<32x64xf32>, vector<8x64xf32> -> vector<8x64xf32>
      %285 = vector.broadcast %12 : vector<1x64xf32> to vector<8x64xf32>
      %286 = arith.addf %284, %285 : vector<8x64xf32>
      %cst_114 = arith.constant 5.000000e-01 : f32
      %287 = vector.broadcast %cst_114 : f32 to vector<8x64xf32>
      %288 = arith.mulf %287, %286 : vector<8x64xf32>
      %cst_115 = arith.constant 1.41421354 : f32
      %289 = vector.broadcast %cst_115 : f32 to vector<8x64xf32>
      %290 = arith.divf %286, %289 : vector<8x64xf32>
      %291 = math.erf %290 : vector<8x64xf32>
      %cst_116 = arith.constant 1.000000e+00 : f32
      %292 = vector.broadcast %cst_116 : f32 to vector<8x64xf32>
      %293 = arith.addf %292, %291 : vector<8x64xf32>
      %294 = arith.mulf %288, %293 : vector<8x64xf32>
      %cst_117 = arith.constant dense<0.000000e+00> : vector<8x64xf32>
      %295 = tpu.matmul %294, %20, %cst_117 {dimension_numbers = #tpu.dot_dimension_numbers<[1], [0], [0], [1], [0, 0, 1, 1], [], []>} : vector<8x64xf32>, vector<64x64xf32>, vector<8x64xf32> -> vector<8x64xf32>
      %296 = vector.broadcast %14 : vector<1x64xf32> to vector<8x64xf32>
      %297 = arith.addf %295, %296 : vector<8x64xf32>
      %298 = arith.mulf %297, %283 : vector<8x64xf32>
      %299 = vector.extract_strided_slice %298 {offsets = [0, 0], sizes = [8, 32], strides = [1, 1]} : vector<8x64xf32> to vector<8x32xf32>
      %300 = vector.extract_strided_slice %298 {offsets = [0, 32], sizes = [8, 32], strides = [1, 1]} : vector<8x64xf32> to vector<8x32xf32>
      %301 = arith.addf %299, %300 : vector<8x32xf32>
      %c0_118 = arith.constant 0 : index
      %c0_119 = arith.constant 0 : index
      %302 = vector.load %arg11[%c0_118, %c0_119] : memref<8x32xf32, #tpu.memory_space<vmem>>, vector<8x32xf32>
      tpu.vector_store %arg11[%c0_118, %c0_119], %301 {strides = array<i32>} : memref<8x32xf32, #tpu.memory_space<vmem>>, vector<8x32xf32>,
    } else {
    }
    %c0_23 = arith.constant 0 : index
    %c0_24 = arith.constant 0 : index
    %c0_25 = arith.constant 0 : index
    %24 = vector.load %arg2[%c0_23, %c0_24, %c0_25] : memref<1x8x32xf32, #tpu.memory_space<vmem>>, vector<1x8x32xf32>
    %25 = vector.shape_cast %24 : vector<1x8x32xf32> to vector<8x32xf32>
    %c0_26 = arith.constant 0 : index
    %c0_27 = arith.constant 0 : index
    %26 = vector.load %arg10[%c0_26, %c0_27] : memref<8x96xf32, #tpu.memory_space<vmem>>, vector<8x32xf32>
    %c0_28 = arith.constant 0 : index
    %c32_29 = arith.constant 32 : index
    %27 = vector.load %arg10[%c0_28, %c32_29] : memref<8x96xf32, #tpu.memory_space<vmem>>, vector<8x32xf32>
    %c0_30 = arith.constant 0 : index
    %c64_31 = arith.constant 64 : index
    %28 = vector.load %arg10[%c0_30, %c64_31] : memref<8x96xf32, #tpu.memory_space<vmem>>, vector<8x32xf32>
    %29 = vector.extract_strided_slice %26 {offsets = [0, 0], sizes = [8, 8], strides = [1, 1]} : vector<8x32xf32> to vector<8x8xf32>
    %30 = vector.extract_strided_slice %27 {offsets = [0, 0], sizes = [8, 8], strides = [1, 1]} : vector<8x32xf32> to vector<8x8xf32>
    %cst_32 = arith.constant dense<0.000000e+00> : vector<8x8xf32>
    %31 = tpu.matmul %29, %30, %cst_32 {dimension_numbers = #tpu.dot_dimension_numbers<[1], [1], [0], [0], [0, 0, 1, 0], [], []>} : vector<8x8xf32>, vector<8x8xf32>, vector<8x8xf32> -> vector<8x8xf32>
    %32 = vector.broadcast %5 : vector<1x8xf32> to vector<8x8xf32>
    %33 = arith.addf %31, %32 : vector<8x8xf32>
    %cst_33 = arith.constant dense<0xFF800000> : vector<8xf32>
    %34 = vector.multi_reduction <maximumf>, %33, %cst_33 [1] : vector<8x8xf32> to vector<8xf32>
    %35 = vector.shape_cast %34 : vector<8xf32> to vector<8x1xf32>
    %36 = vector.broadcast %35 : vector<8x1xf32> to vector<8x8xf32>
    %37 = arith.subf %33, %36 : vector<8x8xf32>
    %38 = math.exp %37 : vector<8x8xf32>
    %cst_34 = arith.constant dense<0.000000e+00> : vector<8xf32>
    %39 = vector.multi_reduction <add>, %38, %cst_34 [1] : vector<8x8xf32> to vector<8xf32>
    %40 = vector.shape_cast %39 : vector<8xf32> to vector<8x1xf32>
    %41 = tpu.reciprocal %40 {approx = true} : vector<8x1xf32> -> vector<8x1xf32>
    %42 = vector.broadcast %41 : vector<8x1xf32> to vector<8x8xf32>
    %43 = arith.mulf %38, %42 : vector<8x8xf32>
    %44 = vector.extract_strided_slice %28 {offsets = [0, 0], sizes = [8, 8], strides = [1, 1]} : vector<8x32xf32> to vector<8x8xf32>
    %cst_35 = arith.constant dense<0.000000e+00> : vector<8x8xf32>
    %45 = tpu.matmul %43, %44, %cst_35 {dimension_numbers = #tpu.dot_dimension_numbers<[1], [0], [0], [1], [0, 0, 1, 1], [], []>} : vector<8x8xf32>, vector<8x8xf32>, vector<8x8xf32> -> vector<8x8xf32>
    %46 = vector.extract_strided_slice %26 {offsets = [0, 8], sizes = [8, 8], strides = [1, 1]} : vector<8x32xf32> to vector<8x8xf32>
    %47 = vector.extract_strided_slice %27 {offsets = [0, 8], sizes = [8, 8], strides = [1, 1]} : vector<8x32xf32> to vector<8x8xf32>
    %cst_36 = arith.constant dense<0.000000e+00> : vector<8x8xf32>
    %48 = tpu.matmul %46, %47, %cst_36 {dimension_numbers = #tpu.dot_dimension_numbers<[1], [1], [0], [0], [0, 0, 1, 0], [], []>} : vector<8x8xf32>, vector<8x8xf32>, vector<8x8xf32> -> vector<8x8xf32>
    %49 = vector.broadcast %5 : vector<1x8xf32> to vector<8x8xf32>
    %50 = arith.addf %48, %49 : vector<8x8xf32>
    %cst_37 = arith.constant dense<0xFF800000> : vector<8xf32>
    %51 = vector.multi_reduction <maximumf>, %50, %cst_37 [1] : vector<8x8xf32> to vector<8xf32>
    %52 = vector.shape_cast %51 : vector<8xf32> to vector<8x1xf32>
    %53 = vector.broadcast %52 : vector<8x1xf32> to vector<8x8xf32>
    %54 = arith.subf %50, %53 : vector<8x8xf32>
    %55 = math.exp %54 : vector<8x8xf32>
    %cst_38 = arith.constant dense<0.000000e+00> : vector<8xf32>
    %56 = vector.multi_reduction <add>, %55, %cst_38 [1] : vector<8x8xf32> to vector<8xf32>
    %57 = vector.shape_cast %56 : vector<8xf32> to vector<8x1xf32>
    %58 = tpu.reciprocal %57 {approx = true} : vector<8x1xf32> -> vector<8x1xf32>
    %59 = vector.broadcast %58 : vector<8x1xf32> to vector<8x8xf32>
    %60 = arith.mulf %55, %59 : vector<8x8xf32>
    %61 = vector.extract_strided_slice %28 {offsets = [0, 8], sizes = [8, 8], strides = [1, 1]} : vector<8x32xf32> to vector<8x8xf32>
    %cst_39 = arith.constant dense<0.000000e+00> : vector<8x8xf32>
    %62 = tpu.matmul %60, %61, %cst_39 {dimension_numbers = #tpu.dot_dimension_numbers<[1], [0], [0], [1], [0, 0, 1, 1], [], []>} : vector<8x8xf32>, vector<8x8xf32>, vector<8x8xf32> -> vector<8x8xf32>
    %63 = vector.extract_strided_slice %26 {offsets = [0, 16], sizes = [8, 8], strides = [1, 1]} : vector<8x32xf32> to vector<8x8xf32>
    %64 = vector.extract_strided_slice %27 {offsets = [0, 16], sizes = [8, 8], strides = [1, 1]} : vector<8x32xf32> to vector<8x8xf32>
    %cst_40 = arith.constant dense<0.000000e+00> : vector<8x8xf32>
    %65 = tpu.matmul %63, %64, %cst_40 {dimension_numbers = #tpu.dot_dimension_numbers<[1], [1], [0], [0], [0, 0, 1, 0], [], []>} : vector<8x8xf32>, vector<8x8xf32>, vector<8x8xf32> -> vector<8x8xf32>
    %66 = vector.broadcast %5 : vector<1x8xf32> to vector<8x8xf32>
    %67 = arith.addf %65, %66 : vector<8x8xf32>
    %cst_41 = arith.constant dense<0xFF800000> : vector<8xf32>
    %68 = vector.multi_reduction <maximumf>, %67, %cst_41 [1] : vector<8x8xf32> to vector<8xf32>
    %69 = vector.shape_cast %68 : vector<8xf32> to vector<8x1xf32>
    %70 = vector.broadcast %69 : vector<8x1xf32> to vector<8x8xf32>
    %71 = arith.subf %67, %70 : vector<8x8xf32>
    %72 = math.exp %71 : vector<8x8xf32>
    %cst_42 = arith.constant dense<0.000000e+00> : vector<8xf32>
    %73 = vector.multi_reduction <add>, %72, %cst_42 [1] : vector<8x8xf32> to vector<8xf32>
    %74 = vector.shape_cast %73 : vector<8xf32> to vector<8x1xf32>
    %75 = tpu.reciprocal %74 {approx = true} : vector<8x1xf32> -> vector<8x1xf32>
    %76 = vector.broadcast %75 : vector<8x1xf32> to vector<8x8xf32>
    %77 = arith.mulf %72, %76 : vector<8x8xf32>
    %78 = vector.extract_strided_slice %28 {offsets = [0, 16], sizes = [8, 8], strides = [1, 1]} : vector<8x32xf32> to vector<8x8xf32>
    %cst_43 = arith.constant dense<0.000000e+00> : vector<8x8xf32>
    %79 = tpu.matmul %77, %78, %cst_43 {dimension_numbers = #tpu.dot_dimension_numbers<[1], [0], [0], [1], [0, 0, 1, 1], [], []>} : vector<8x8xf32>, vector<8x8xf32>, vector<8x8xf32> -> vector<8x8xf32>
    %80 = vector.extract_strided_slice %26 {offsets = [0, 24], sizes = [8, 8], strides = [1, 1]} : vector<8x32xf32> to vector<8x8xf32>
    %81 = vector.extract_strided_slice %27 {offsets = [0, 24], sizes = [8, 8], strides = [1, 1]} : vector<8x32xf32> to vector<8x8xf32>
    %cst_44 = arith.constant dense<0.000000e+00> : vector<8x8xf32>
    %82 = tpu.matmul %80, %81, %cst_44 {dimension_numbers = #tpu.dot_dimension_numbers<[1], [1], [0], [0], [0, 0, 1, 0], [], []>} : vector<8x8xf32>, vector<8x8xf32>, vector<8x8xf32> -> vector<8x8xf32>
    %83 = vector.broadcast %5 : vector<1x8xf32> to vector<8x8xf32>
    %84 = arith.addf %82, %83 : vector<8x8xf32>
    %cst_45 = arith.constant dense<0xFF800000> : vector<8xf32>
    %85 = vector.multi_reduction <maximumf>, %84, %cst_45 [1] : vector<8x8xf32> to vector<8xf32>
    %86 = vector.shape_cast %85 : vector<8xf32> to vector<8x1xf32>
    %87 = vector.broadcast %86 : vector<8x1xf32> to vector<8x8xf32>
    %88 = arith.subf %84, %87 : vector<8x8xf32>
    %89 = math.exp %88 : vector<8x8xf32>
    %cst_46 = arith.constant dense<0.000000e+00> : vector<8xf32>
    %90 = vector.multi_reduction <add>, %89, %cst_46 [1] : vector<8x8xf32> to vector<8xf32>
    %91 = vector.shape_cast %90 : vector<8xf32> to vector<8x1xf32>
    %92 = tpu.reciprocal %91 {approx = true} : vector<8x1xf32> -> vector<8x1xf32>
    %93 = vector.broadcast %92 : vector<8x1xf32> to vector<8x8xf32>
    %94 = arith.mulf %89, %93 : vector<8x8xf32>
    %95 = vector.extract_strided_slice %28 {offsets = [0, 24], sizes = [8, 8], strides = [1, 1]} : vector<8x32xf32> to vector<8x8xf32>
    %cst_47 = arith.constant dense<0.000000e+00> : vector<8x8xf32>
    %96 = tpu.matmul %94, %95, %cst_47 {dimension_numbers = #tpu.dot_dimension_numbers<[1], [0], [0], [1], [0, 0, 1, 1], [], []>} : vector<8x8xf32>, vector<8x8xf32>, vector<8x8xf32> -> vector<8x8xf32>
    %97 = tpu.concatenate %45, %62, %79, %96 in 1 : vector<8x8xf32>, vector<8x8xf32>, vector<8x8xf32>, vector<8x8xf32> -> vector<8x32xf32>
    %cst_48 = arith.constant dense<0.000000e+00> : vector<8x32xf32>
    %98 = tpu.matmul %97, %15, %cst_48 {dimension_numbers = #tpu.dot_dimension_numbers<[1], [0], [0], [1], [0, 0, 1, 1], [], []>} : vector<8x32xf32>, vector<32x32xf32>, vector<8x32xf32> -> vector<8x32xf32>
    %99 = vector.broadcast %7 : vector<1x32xf32> to vector<8x32xf32>
    %100 = arith.addf %98, %99 : vector<8x32xf32>
    %101 = arith.addf %100, %25 : vector<8x32xf32>
    %102 = arith.mulf %101, %101 : vector<8x32xf32>
    %cst_49 = arith.constant dense<0.000000e+00> : vector<8xf32>
    %103 = vector.multi_reduction <add>, %102, %cst_49 [1] : vector<8x32xf32> to vector<8xf32>
    %104 = vector.shape_cast %103 : vector<8xf32> to vector<8x1xf32>
    %cst_50 = arith.constant 3.200000e+01 : f32
    %105 = vector.broadcast %cst_50 : f32 to vector<8x1xf32>
    %106 = arith.divf %104, %105 : vector<8x1xf32>
    %cst_51 = arith.constant 9.99999997E-7 : f32
    %107 = vector.broadcast %cst_51 : f32 to vector<8x1xf32>
    %108 = arith.addf %106, %107 : vector<8x1xf32>
    %109 = math.rsqrt %108 : vector<8x1xf32>
    %110 = vector.broadcast %109 : vector<8x1xf32> to vector<8x32xf32>
    %111 = arith.mulf %101, %110 : vector<8x32xf32>
    %112 = vector.broadcast %9 : vector<1x32xf32> to vector<8x32xf32>
    %113 = arith.mulf %112, %111 : vector<8x32xf32>
    %c0_52 = arith.constant 0 : index
    %c0_53 = arith.constant 0 : index
    %114 = vector.load %arg8[%c0_52, %c0_53] : memref<8x64xf32, #tpu.memory_space<vmem>>, vector<8x64xf32>
    %cst_54 = arith.constant dense<0.000000e+00> : vector<8x64xf32>
    %115 = tpu.matmul %113, %17, %cst_54 {dimension_numbers = #tpu.dot_dimension_numbers<[1], [0], [0], [1], [0, 0, 1, 1], [], []>} : vector<8x32xf32>, vector<32x64xf32>, vector<8x64xf32> -> vector<8x64xf32>
    %116 = vector.broadcast %11 : vector<1x64xf32> to vector<8x64xf32>
    %117 = arith.addf %115, %116 : vector<8x64xf32>
    %cst_55 = arith.constant 5.000000e-01 : f32
    %118 = vector.broadcast %cst_55 : f32 to vector<8x64xf32>
    %119 = arith.mulf %118, %117 : vector<8x64xf32>
    %cst_56 = arith.constant 1.41421354 : f32
    %120 = vector.broadcast %cst_56 : f32 to vector<8x64xf32>
    %121 = arith.divf %117, %120 : vector<8x64xf32>
    %122 = math.erf %121 : vector<8x64xf32>
    %cst_57 = arith.constant 1.000000e+00 : f32
    %123 = vector.broadcast %cst_57 : f32 to vector<8x64xf32>
    %124 = arith.addf %123, %122 : vector<8x64xf32>
    %125 = arith.mulf %119, %124 : vector<8x64xf32>
    %cst_58 = arith.constant dense<0.000000e+00> : vector<8x64xf32>
    %126 = tpu.matmul %125, %19, %cst_58 {dimension_numbers = #tpu.dot_dimension_numbers<[1], [0], [0], [1], [0, 0, 1, 1], [], []>} : vector<8x64xf32>, vector<64x64xf32>, vector<8x64xf32> -> vector<8x64xf32>
    %127 = vector.broadcast %13 : vector<1x64xf32> to vector<8x64xf32>
    %128 = arith.addf %126, %127 : vector<8x64xf32>
    %129 = arith.mulf %128, %114 : vector<8x64xf32>
    %130 = vector.extract_strided_slice %129 {offsets = [0, 0], sizes = [8, 32], strides = [1, 1]} : vector<8x64xf32> to vector<8x32xf32>
    %131 = vector.extract_strided_slice %129 {offsets = [0, 32], sizes = [8, 32], strides = [1, 1]} : vector<8x64xf32> to vector<8x32xf32>
    %132 = arith.addf %130, %131 : vector<8x32xf32>
    %c0_59 = arith.constant 0 : index
    %c0_60 = arith.constant 0 : index
    %133 = vector.load %arg11[%c0_59, %c0_60] : memref<8x32xf32, #tpu.memory_space<vmem>>, vector<8x32xf32>
    %134 = tpu.iota {dimensions = array<i32: 0>} : vector<8x8xi32>
    %c0_i32_61 = arith.constant 0 : i32
    %135 = vector.broadcast %c0_i32_61 : i32 to vector<8x8xi32>
    %136 = arith.addi %134, %135 : vector<8x8xi32>
    %137 = tpu.iota {dimensions = array<i32: 1>} : vector<8x8xi32>
    %cst_62 = arith.constant 1.000000e+00 : f32
    %138 = vector.broadcast %cst_62 : f32 to vector<1x8xf32>
    %139 = arith.subf %138, %1 : vector<1x8xf32>
    %cst_63 = arith.constant 0.000000e+00 : f32
    %140 = vector.broadcast %cst_63 : f32 to vector<1x8xf32>
    %141 = arith.subf %140, %139 : vector<1x8xf32>
    %cst_64 = arith.constant 9.99999995E+11 : f32
    %142 = vector.broadcast %cst_64 : f32 to vector<1x8xf32>
    %143 = arith.mulf %141, %142 : vector<1x8xf32>
    %144 = arith.cmpi sgt, %136, %137 : vector<8x8xi32>
    %145 = arith.extui %144 : vector<8x8xi1> to vector<8x8xi32>
    %146 = arith.sitofp %145 : vector<8x8xi32> to vector<8x8xf32>
    %cst_65 = arith.constant 9.99999995E+11 : f32
    %147 = vector.broadcast %cst_65 : f32 to vector<8x8xf32>
    %148 = arith.mulf %146, %147 : vector<8x8xf32>
    %149 = vector.broadcast %143 : vector<1x8xf32> to vector<8x8xf32>
    %150 = arith.subf %149, %148 : vector<8x8xf32>
    %151 = vector.extract_strided_slice %132 {offsets = [0, 0], sizes = [8, 8], strides = [1, 1]} : vector<8x32xf32> to vector<8x8xf32>
    %152 = vector.extract_strided_slice %133 {offsets = [0, 0], sizes = [8, 8], strides = [1, 1]} : vector<8x32xf32> to vector<8x8xf32>
    %cst_66 = arith.constant dense<0.000000e+00> : vector<8x8xf32>
    %153 = tpu.matmul %151, %152, %cst_66 {dimension_numbers = #tpu.dot_dimension_numbers<[1], [1], [0], [0], [0, 0, 1, 0], [], []>} : vector<8x8xf32>, vector<8x8xf32>, vector<8x8xf32> -> vector<8x8xf32>
    %154 = vector.broadcast %1 : vector<1x8xf32> to vector<8x8xf32>
    %155 = arith.mulf %153, %154 : vector<8x8xf32>
    %156 = arith.addf %155, %150 : vector<8x8xf32>
    %c0_67 = arith.constant 0 : index
    %c0_68 = arith.constant 0 : index
    %c0_69 = arith.constant 0 : index
    %c0_70 = arith.constant 0 : index
    %157 = vector.load %arg9[%c0_67, %c0_68, %c0_69, %c0_70] : memref<1x4x8x8xf32, #tpu.memory_space<vmem>>, vector<1x1x8x8xf32>
    %158 = vector.shape_cast %157 : vector<1x1x8x8xf32> to vector<8x8xf32>
    %159 = vector.shape_cast %156 : vector<8x8xf32> to vector<1x1x8x8xf32>
    tpu.vector_store %arg9[%c0_67, %c0_68, %c0_69, %c0_70], %159 {strides = array<i32>} : memref<1x4x8x8xf32, #tpu.memory_space<vmem>>, vector<1x1x8x8xf32>,
    %160 = vector.extract_strided_slice %132 {offsets = [0, 8], sizes = [8, 8], strides = [1, 1]} : vector<8x32xf32> to vector<8x8xf32>
    %161 = vector.extract_strided_slice %133 {offsets = [0, 8], sizes = [8, 8], strides = [1, 1]} : vector<8x32xf32> to vector<8x8xf32>
    %cst_71 = arith.constant dense<0.000000e+00> : vector<8x8xf32>
    %162 = tpu.matmul %160, %161, %cst_71 {dimension_numbers = #tpu.dot_dimension_numbers<[1], [1], [0], [0], [0, 0, 1, 0], [], []>} : vector<8x8xf32>, vector<8x8xf32>, vector<8x8xf32> -> vector<8x8xf32>
    %163 = vector.broadcast %1 : vector<1x8xf32> to vector<8x8xf32>
    %164 = arith.mulf %162, %163 : vector<8x8xf32>
    %165 = arith.addf %164, %150 : vector<8x8xf32>
    %c0_72 = arith.constant 0 : index
    %c1 = arith.constant 1 : index
    %c0_73 = arith.constant 0 : index
    %c0_74 = arith.constant 0 : index
    %166 = vector.load %arg9[%c0_72, %c1, %c0_73, %c0_74] : memref<1x4x8x8xf32, #tpu.memory_space<vmem>>, vector<1x1x8x8xf32>
    %167 = vector.shape_cast %166 : vector<1x1x8x8xf32> to vector<8x8xf32>
    %168 = vector.shape_cast %165 : vector<8x8xf32> to vector<1x1x8x8xf32>
    tpu.vector_store %arg9[%c0_72, %c1, %c0_73, %c0_74], %168 {strides = array<i32>} : memref<1x4x8x8xf32, #tpu.memory_space<vmem>>, vector<1x1x8x8xf32>,
    %169 = vector.extract_strided_slice %132 {offsets = [0, 16], sizes = [8, 8], strides = [1, 1]} : vector<8x32xf32> to vector<8x8xf32>
    %170 = vector.extract_strided_slice %133 {offsets = [0, 16], sizes = [8, 8], strides = [1, 1]} : vector<8x32xf32> to vector<8x8xf32>
    %cst_75 = arith.constant dense<0.000000e+00> : vector<8x8xf32>
    %171 = tpu.matmul %169, %170, %cst_75 {dimension_numbers = #tpu.dot_dimension_numbers<[1], [1], [0], [0], [0, 0, 1, 0], [], []>} : vector<8x8xf32>, vector<8x8xf32>, vector<8x8xf32> -> vector<8x8xf32>
    %172 = vector.broadcast %1 : vector<1x8xf32> to vector<8x8xf32>
    %173 = arith.mulf %171, %172 : vector<8x8xf32>
    %174 = arith.addf %173, %150 : vector<8x8xf32>
    %c0_76 = arith.constant 0 : index
    %c2 = arith.constant 2 : index
    %c0_77 = arith.constant 0 : index
    %c0_78 = arith.constant 0 : index
    %175 = vector.load %arg9[%c0_76, %c2, %c0_77, %c0_78] : memref<1x4x8x8xf32, #tpu.memory_space<vmem>>, vector<1x1x8x8xf32>
    %176 = vector.shape_cast %175 : vector<1x1x8x8xf32> to vector<8x8xf32>
    %177 = vector.shape_cast %174 : vector<8x8xf32> to vector<1x1x8x8xf32>
    tpu.vector_store %arg9[%c0_76, %c2, %c0_77, %c0_78], %177 {strides = array<i32>} : memref<1x4x8x8xf32, #tpu.memory_space<vmem>>, vector<1x1x8x8xf32>,
    %178 = vector.extract_strided_slice %132 {offsets = [0, 24], sizes = [8, 8], strides = [1, 1]} : vector<8x32xf32> to vector<8x8xf32>
    %179 = vector.extract_strided_slice %133 {offsets = [0, 24], sizes = [8, 8], strides = [1, 1]} : vector<8x32xf32> to vector<8x8xf32>
    %cst_79 = arith.constant dense<0.000000e+00> : vector<8x8xf32>
    %180 = tpu.matmul %178, %179, %cst_79 {dimension_numbers = #tpu.dot_dimension_numbers<[1], [1], [0], [0], [0, 0, 1, 0], [], []>} : vector<8x8xf32>, vector<8x8xf32>, vector<8x8xf32> -> vector<8x8xf32>
    %181 = vector.broadcast %1 : vector<1x8xf32> to vector<8x8xf32>
    %182 = arith.mulf %180, %181 : vector<8x8xf32>
    %183 = arith.addf %182, %150 : vector<8x8xf32>
    %c0_80 = arith.constant 0 : index
    %c3 = arith.constant 3 : index
    %c0_81 = arith.constant 0 : index
    %c0_82 = arith.constant 0 : index
    %184 = vector.load %arg9[%c0_80, %c3, %c0_81, %c0_82] : memref<1x4x8x8xf32, #tpu.memory_space<vmem>>, vector<1x1x8x8xf32>
    %185 = vector.shape_cast %184 : vector<1x1x8x8xf32> to vector<8x8xf32>
    %186 = vector.shape_cast %183 : vector<8x8xf32> to vector<1x1x8x8xf32>
    tpu.vector_store %arg9[%c0_80, %c3, %c0_81, %c0_82], %186 {strides = array<i32>} : memref<1x4x8x8xf32, #tpu.memory_space<vmem>>, vector<1x1x8x8xf32>,
    return
  }
  func.func @transform_0(%arg0: i32, %arg1: i32) -> (i32, i32, i32) {
    %c0_i32 = arith.constant 0 : i32
    %c0_i32_0 = arith.constant 0 : i32
    %c0_i32_1 = arith.constant 0 : i32
    return %arg0, %c0_i32, %c0_i32_0 : i32, i32, i32
  }
  func.func @transform_1(%arg0: i32, %arg1: i32) -> (i32, i32, i32) {
    %c0_i32 = arith.constant 0 : i32
    %c0_i32_0 = arith.constant 0 : i32
    %c0_i32_1 = arith.constant 0 : i32
    return %arg0, %c0_i32, %c0_i32_0 : i32, i32, i32
  }
  func.func @transform_2(%arg0: i32, %arg1: i32) -> (i32, i32) {
    %c0_i32 = arith.constant 0 : i32
    %c0_i32_0 = arith.constant 0 : i32
    %c0_i32_1 = arith.constant 0 : i32
    return %c0_i32, %c0_i32_0 : i32, i32
  }
  func.func @transform_3(%arg0: i32, %arg1: i32) -> (i32, i32) {
    %c0_i32 = arith.constant 0 : i32
    %c0_i32_0 = arith.constant 0 : i32
    %c0_i32_1 = arith.constant 0 : i32
    return %c0_i32, %c0_i32_0 : i32, i32
  }
  func.func @transform_4(%arg0: i32, %arg1: i32) -> (i32, i32) {
    %c0_i32 = arith.constant 0 : i32
    %c0_i32_0 = arith.constant 0 : i32
    %c0_i32_1 = arith.constant 0 : i32
    return %c0_i32, %c0_i32_0 : i32, i32
  }
  func.func @transform_5(%arg0: i32, %arg1: i32) -> (i32, i32) {
    %c0_i32 = arith.constant 0 : i32
    %c0_i32_0 = arith.constant 0 : i32
    %c0_i32_1 = arith.constant 0 : i32
    return %c0_i32, %c0_i32_0 : i32, i32
  }
  func.func @transform_6(%arg0: i32, %arg1: i32) -> (i32, i32) {
    %c0_i32 = arith.constant 0 : i32
    %c0_i32_0 = arith.constant 0 : i32
    %c0_i32_1 = arith.constant 0 : i32
    return %c0_i32, %c0_i32_0 : i32, i32
  }
  func.func @transform_7(%arg0: i32, %arg1: i32) -> (i32, i32, i32, i32) {
    %c0_i32 = arith.constant 0 : i32
    %c0_i32_0 = arith.constant 0 : i32
    %c0_i32_1 = arith.constant 0 : i32
    return %arg0, %c0_i32, %arg1, %c0_i32_0 : i32, i32, i32, i32
  }
}

</mosaic_0001>

<bundles_post_ra>
// kernel: tpu_custom_call.1
= control target key start
LH: loop header
LB: loop body
LE: loop exit
PB: predicated region body
PF: predicated region fallthrough
CT: control target
= control target key end

     0   :  { %s4468_s0 = inlined_call_operand.hbm [shape: f32[2,8,32], index: 0, kind: input, shape index: {}]   ;;  %s4469_s1 = inlined_call_operand.vmem [shape: f32[2,1,8], index: 1, kind: input, shape index: {}]   ;;  %s4470_s2 = inlined_call_operand.hbm [shape: f32[32,192], index: 2, kind: input, shape index: {}]   ;;  %s4471_s3 = inlined_call_operand.hbm [shape: f32[32,192], index: 3, kind: input, shape index: {}]   ;;  %s4472_s4 = inlined_call_operand.hbm [shape: f32[64,128], index: 4, kind: input, shape index: {}]   ;;  %s4473_s5 = inlined_call_operand.vmem [shape: f32[1,576], index: 5, kind: input, shape index: {}]   ;;  %s4474_s6 = inlined_call_operand.vmem [shape: f32[8,64], index: 6, kind: input, shape index: {}]   ;;  %s4475_s7 = inlined_call_operand.hbm [shape: f32[2,4,8,8], index: 7, kind: output, shape index: {}]  }
   0x1   :  { %4483 = sst [smem:[#allocation19_spill]] %s4474_s6 }
   0x2   :  { %4484 = sst [smem:[#allocation20_spill]] %s4475_s7 }
   0x3   :  { %12 = vsyncpa [#allocation5], 0 }
   0x4   :  { %14 = vsyncpa [#allocation5 + $0x1], 0 }
   0x5   :  { %15 = vsyncpa [#allocation8], 0 }
   0x6   :  { %16 = vsyncpa [#allocation11], 0 }
   0x7   :  { %17 = vsyncpa [#allocation6], 0 }
   0x8   :  { %19 = vsyncpa [#allocation6 + $0x1], 0  ;;  %s3810_s24 = smov 0   ;;  %s3812_s25 = smov 0  }
   0x9   :  { %s3814_s26 = smov 0   ;;  %s3816_s27 = smov 0  }
   0xa   :  { %s3818_s28 = smov 0   ;;  %s3820_s29 = smov 0  }
   0xb LB: > { %4485 = sst [smem:[#allocation17_spill]] %s3720_s24  ;;  %s2956_s30 = sadd.s32 4294967295, %s3740_s29   ;;  %s3740_s29 = sphi %s3820_s29, %s25_s29   ;;  %s3736_s28 = sphi %s3818_s28, %s4510_s28   ;;  %s3732_s27 = sphi %s3816_s27, %s4509_s27   ;;  %s3728_s26 = sphi %s3814_s26, %s4508_s26   ;;  %s3724_s25 = sphi %s3812_s25, %s4507_s25   ;;  %s3720_s24 = sphi %s3810_s24, %s4506_s24  }
   0xc   : > { %s2957_s8 = sadd.s32 4294967294, %s3740_s29   ;;  %p57_p0 = scmp.ne.s32.totalorder %s3724_s25, %s3720_s24 }
   0xd   : > { %p3844_p1 = scmp.eq.s32.totalorder %s2956_s30, 0  ;;  %p3848_p2 = scmp.eq.s32.totalorder %s2956_s30, 1 }
   0xe   : > { %p220_p3 = scmp.eq.s32.totalorder %s2957_s8, 1  ;;  %p2958_p5 = scmp.ge.s32.totalorder %s3740_s29, 1 }
   0xf   : > { %s4486_s9 = scalar_select %p3844_p1, 1, 0 }
  0x10   : > { %s4487_s10 = scalar_select %p3848_p2, 1, 0 }
  0x11   : > { %p3854_p4 = por %p3844_p1, %p57_p0  ;;  %p3859_p6 = por %p220_p3, %p57_p0 }
  0x12   : > { %p227_p7 = scmp.lt.s32.totalorder %s3740_s29, 3  ;;  %s3742_s14 = smov [#allocation7]  }
  0x13   : > { %s4488_s11 = scalar_select %p3854_p4, 1, 0 }
  0x14   : > { %s4489_s12 = scalar_select %p3859_p6, 1, 0 }
  0x15   : > { %p3864_p8 = pnand %p2958_p5, %p227_p7  ;;  %s239_s15 = sshll.u32 %s3742_s14, 4  ;;  %s3868_s15 = int_to_ptr.vmem [resolvable:$true] %s239_s15 }
  0x16   : > { %4490 = sst [smem:[#allocation18_spill]] %s4489_s12  ;;  %s3743_s17 = smov [#allocation9]  }
  0x17   : > { %s4491_s13 = scalar_select %p3864_p8, 1, 0 }
  0x18   : > { %p3356_p9 = pneg %p3864_p8  ;;  %s252_s18 = sshll.u32 %s3743_s17, 4  ;;  %s3879_s18 = int_to_ptr.vmem [resolvable:$true] %s252_s18 }
  0x19   : > { %s3744_s19 = smov [#allocation10]   ;;  %s3536_s23 = scalar_lea.hbm %s4470_s2, 1024 }
  0x1a   : > { %p3875_p11 = pnand %p3356_p9, %p3844_p1  ;;  %s3881_s20 = sshll.u32 %s3744_s19, 4  ;;  %s266_s20 = int_to_ptr.vmem [resolvable:$true] %s3881_s20 }
  0x1b   : > { %p3537_p12 = scmp.ne.s32.totalorder %s4470_s2, %s3536_s23  ;;  %p3543_p5 = scmp.lt.u32.totalorder %s3536_s23, %s4470_s2 }
  0x1c   : > { %p3891_p13 = pneg %p3875_p11 }
  0x1e   : > { %p3539_p0 = pnand %p3891_p13, %p3537_p12 }
  0x20   : > { %p3540_p3 = pneg %p3539_p0 }
  0x22   : > { %p3545_p7 = pnand %p3543_p5, %p3540_p3 }
  0x24   : > { %3548 = shalt.err (!%p3545_p7)
}
  0x25   : > { %s3549_s21 = scalar_lea.vmem %s3868_s15, 1024  ;;  %p3557_p1 = scmp.lt.s32.totalorder %s3868_s15, %s3868_s15 }
  0x26   : > { %p3550_p9 = scmp.ne.s32.totalorder %s3868_s15, %s3549_s21  ;;  %p3558_p4 = scmp.lt.s32.totalorder %s3549_s21, %s3549_s21 }
  0x28   : > { %p3552_p10 = pnand %p3550_p9, %p3891_p13  ;;  %p3559_p12 = por %p3558_p4, %p3557_p1 }
  0x2a   : > { %p3553_p6 = pneg %p3552_p10 }
  0x2c   : > { %p3560_p0 = pnand %p3559_p12, %p3553_p6 }
  0x2e   : > { %3563 = shalt.err (!%p3560_p0)
}
  0x2f   : > { %s3745_s22 = smov 256   ;;  %s3746_s23 = smov 16  }
  0x30   : > { %3359 = dma.hbm_to_vmem [thread:$0]  (!%p3875_p11), %s4470_s2, 1024, %s3868_s15, [#allocation8], %s3745_s22, %s3745_s22, %s3746_s23  }
  0x31   : > { %s3564_s12 = scalar_lea.hbm %s4471_s3, 1024 }
  0x32   : > { %p3565_p1 = scmp.ne.s32.totalorder %s4471_s3, %s3564_s12  ;;  %p3571_p10 = scmp.lt.u32.totalorder %s3564_s12, %s4471_s3 }
  0x34   : > { %p3567_p4 = pnand %p3565_p1, %p3891_p13 }
  0x36   : > { %p3568_p6 = pneg %p3567_p4 }
  0x38   : > { %p3573_p3 = pnand %p3571_p10, %p3568_p6 }
  0x3a   : > { %3576 = shalt.err (!%p3573_p3)
}
  0x3b   : > { %s3577_s15 = scalar_lea.vmem %s3879_s18, 1024  ;;  %p3585_p12 = scmp.lt.s32.totalorder %s3879_s18, %s3879_s18 }
  0x3c   : > { %p3578_p5 = scmp.ne.s32.totalorder %s3879_s18, %s3577_s15  ;;  %p3586_p0 = scmp.lt.s32.totalorder %s3577_s15, %s3577_s15 }
  0x3e   : > { %p3580_p7 = pnand %p3578_p5, %p3891_p13  ;;  %p3587_p1 = por %p3586_p0, %p3585_p12 }
  0x40   : > { %p3581_p9 = pneg %p3580_p7 }
  0x42   : > { %p3588_p4 = pnand %p3587_p1, %p3581_p9 }
  0x44   : > { %3591 = shalt.err (!%p3588_p4)
}
  0x45   : > { %3362 = dma.hbm_to_vmem [thread:$0]  (!%p3875_p11), %s4471_s3, 1024, %s3879_s18, [#allocation8], %s3745_s22, %s3745_s22, %s3746_s23  }
  0x46   : > { %s3592_s30 = scalar_lea.hbm %s4472_s4, 1024 }
  0x47   : > { %p3593_p6 = scmp.ne.s32.totalorder %s4472_s4, %s3592_s30  ;;  %p3599_p5 = scmp.lt.u32.totalorder %s3592_s30, %s4472_s4 }
  0x49   : > { %p3595_p10 = pnand %p3593_p6, %p3891_p13 }
  0x4b   : > { %p3596_p3 = pneg %p3595_p10 }
  0x4d   : > { %p3601_p7 = pnand %p3599_p5, %p3596_p3 }
  0x4f   : > { %3604 = shalt.err (!%p3601_p7)
}
  0x50   : > { %s3605_s15 = scalar_lea.vmem %s266_s20, 1024  ;;  %p3613_p1 = scmp.lt.s32.totalorder %s266_s20, %s266_s20 }
  0x51   : > { %p3606_p9 = scmp.ne.s32.totalorder %s266_s20, %s3605_s15  ;;  %p3614_p4 = scmp.lt.s32.totalorder %s3605_s15, %s3605_s15 }
  0x53   : > { %p3608_p12 = pnand %p3606_p9, %p3891_p13  ;;  %p3615_p8 = por %p3614_p4, %p3613_p1 }
  0x55   : > { %p3609_p0 = pneg %p3608_p12 }
  0x57   : > { %p3616_p2 = pnand %p3615_p8, %p3609_p0 }
  0x59   : > { %3619 = shalt.err (!%p3616_p2)
}
  0x5a   : > { %s3747_s18 = smov 128   ;;  %s3748_s14 = smov 8  }
  0x5b   : > { %3365 = dma.hbm_to_vmem [thread:$0]  (!%p3875_p11), %s4472_s4, 1024, %s266_s20, [#allocation11], %s3747_s18, %s3747_s18, %s3748_s14  }
  0x5c   : > { %s44_s6 = sadd.s32 1, %s3728_s26  ;;  %s37_s7 = sadd.s32 1, %s3736_s28 }
  0x5d   : > { %p51_p2 = scmp.ne.s32.totalorder %s3728_s26, %s3724_s25  ;;  %p39_p8 = scmp.ge.s32.totalorder %s37_s7, 2 }
  0x5e   : > { %p52_p13 = scmp.eq.s32.totalorder %s3740_s29, 0  ;;  %p4494_p6 = scmp.ne.s32.totalorder %s4487_s10, 0 }
  0x5f   : > { %p3377_p3 = scmp.lt.s32.totalorder %s3740_s29, 2  ;;  %s4512_s7 = smov (%p39_p8, %s37_s7), 0 }
  0x60   : > { %p3961_p10 = por %p4494_p6, %p51_p2  ;;  %p53_p5 = por %p52_p13, %p51_p2 }
  0x61   : > { %s285_s16 = sand.u32 1, %s3728_s26   ;;  %s41_s12 = ssub.s32 %s3736_s28, %s4512_s7 }
  0x62   : > { %p42_p7 = scmp.eq.s32.totalorder %s41_s12, 0  ;;  %s2963_s20 = sshll.u32 %s285_s16, 3 }
  0x63   : > { %s2964_s30 = sshll.u32 %s3736_s28, 7  ;;  %s289_s21 = scalar_lea.vmem [#allocation4], %s2963_s20 }
  0x64   : > { %s3973_s8 = scalar_select %p42_p7, %s3728_s26, %s44_s6  }
  0x65   : > { %s3978_s10 = scalar_lea.hbm %s4468_s0, %s2964_s30  ;;  %s296_s15 = sshll.u32 %s289_s21, 4  ;;  %s3980_s15 = int_to_ptr.vmem [resolvable:$true] %s296_s15 }
  0x66   : > { %p3984_p11 = pnand %p3377_p3, %p53_p5  ;;  %s286_s14 = scalar_lea.sflag [#allocation5], %s285_s16 }
  0x67   : > { %s3620_s22 = scalar_lea.hbm %s3978_s10, 128  ;;  %s3625_s12 = scalar_lea.hbm %s4468_s0, 256 }
  0x68   : > { %p3621_p9 = scmp.ne.s32.totalorder %s3978_s10, %s3620_s22  ;;  %p3622_p12 = pneg %p3984_p11 }
  0x69   : > { %p3626_p4 = scmp.lt.u32.totalorder %s3978_s10, %s4468_s0  ;;  %p3627_p2 = scmp.lt.u32.totalorder %s3625_s12, %s3620_s22 }
  0x6a   : > { %p3623_p0 = pnand %p3622_p12, %p3621_p9  ;;  %p3629_p13 = scmp.lt.u32.totalorder %s3620_s22, %s3978_s10 }
  0x6b   : > { %p3628_p8 = por %p3627_p2, %p3626_p4 }
  0x6c   : > { %p3624_p1 = pneg %p3623_p0 }
  0x6d   : > { %p3630_p6 = por %p3629_p13, %p3628_p8 }
  0x6f   : > { %p3631_p3 = pnand %p3630_p6, %p3624_p1 }
  0x71   : > { %3634 = shalt.err (!%p3631_p3)
}
  0x72   : > { %s3635_s16 = scalar_lea.vmem %s3980_s15, 128  ;;  %s3749_s17 = smov [#allocation4]  }
  0x73   : > { %p3636_p5 = scmp.ne.s32.totalorder %s3980_s15, %s3635_s16  ;;  %s3640_s19 = sshll.u32 %s3749_s17, 4  ;;  %s3641_s19 = int_to_ptr.vmem [resolvable:$false] %s3640_s19 }
  0x74   : > { %s3642_s21 = scalar_lea.vmem %s3641_s19, 256  ;;  %p3643_p0 = scmp.lt.s32.totalorder %s3980_s15, %s3641_s19 }
  0x75   : > { %p3638_p7 = pnand %p3636_p5, %p3622_p12  ;;  %p3644_p4 = scmp.lt.s32.totalorder %s3642_s21, %s3635_s16 }
  0x77   : > { %p3639_p9 = pneg %p3638_p7  ;;  %p3645_p2 = por %p3644_p4, %p3643_p0 }
  0x79   : > { %p3646_p8 = pnand %p3645_p2, %p3639_p9 }
  0x7b   : > { %3649 = shalt.err (!%p3646_p8)
}
  0x7c   : > { %3369 = dma.hbm_to_vmem [thread:$0]  (!%p3984_p11), %s3978_s10, 128, %s3980_s15, %s286_s14  }
  0x7d   : > { %p4497_p1 = scmp.ne.s32.totalorder %s4491_s13, 0 }
  0x7e   : > { %s4016_s22 = sand.u32 (!%p4497_p1), 1, %s3724_s25   ;;  %p4498_p12 = scmp.ne.s32.totalorder (!%p4497_p1), %s4488_s11, 0 }
  0x7f   : > { %311 = sbr.rel (%p4497_p1) target bundleno = 4712 (0x1268), region = 48  ;;  %s2966_s23 = sshll.u32 (!%p4497_p1), %s4016_s22, 3 }
  0x80   : > { %s314_s6 = scalar_lea.sflag (!%p4497_p1), [#allocation5], %s4016_s22  ;;  %s317_s12 = scalar_lea.vmem (!%p4497_p1), [#allocation4], %s2966_s23 }
  0x86   : > { %3703 = dma.done.wait (%p4498_p12), %s314_s6, 128  }
  0x87   : > { %3705 = vsyncadd (%p4498_p12), %s314_s6, 4294967168  ;;  %p4499_p13 = scmp.ne.s32.totalorder %s4486_s9, 0 }
  0x89   : > { %3707 = dma.done.wait (%p4499_p13), [#allocation8], 2048  }
  0x8a   : > { %3709 = vsyncadd (%p4499_p13), [#allocation8], 4294965248 }
  0x8b   : > { %3711 = dma.done.wait (%p4499_p13), [#allocation11], 1024  }
  0x8c   : > { %3713 = vsyncadd (%p4499_p13), [#allocation11], 4294966272  ;;  %v3750_v0 = vmov 0.0   ;;  %v396_v1 = vld [vmem:[#allocation7 + $0x8] sm:$0xff]  ;;  %v398_v2 = vld [vmem:[#allocation7 + $0x18] sm:$0xff]  ;;  %vm414_vm0 = vcmask 261120   ;;  %v404_v14 = vlaneseq }
  0x8d   : > { %482 = vmatprep.mubr.f32.mxu0 %v3750_v0  ;;  %3102 = vmatprep.subr.mxu1 %v3750_v0  ;;  %v395_v3 = vld [vmem:[#allocation7] sm:$0xff]  ;;  %v3284_v4 = vpack.c.bf16 %v398_v2, %v396_v1  ;;  %v397_v5 = vld [vmem:[#allocation7 + $0x10] sm:$0xff]  ;;  %v400_v6 = vld [vmem:[#allocation7 + $0x28] sm:$0xff]  ;;  %vm3751_vm1 = vmmov 0   ;;  %vm489_vm2 = vcmask 785408   ;;  %vm500_vm3 = vcmask 64512  }
  0x8e   : > { %v402_v7 = vld [vmem:[#allocation7 + $0x38] sm:$0xff]  ;;  %v3286_v8 = vpack.c.bf16 %v397_v5, %v395_v3  ;;  %v399_v10 = vld [vmem:[#allocation7 + $0x20] sm:$0xff]  ;;  %v401_v11 = vld [vmem:[#allocation7 + $0x30] sm:$0xff]  ;;  %3104 = vmatprep.mubr.msk.f32.mxu1 %vm3751_vm1, %v3750_v0  ;;  %v4044_v15 = vshrl.u32 %v404_v14, 7  ;;  %s3752_s13 = smov 24   ;;  %s3753_s10 = smov 32  }
  0x8f   : > { %v3288_v9 = vpack.c.bf16 %v402_v7, %v400_v6  ;;  %3285 = vmatprep.subr.bf16.mxu0 %v3284_v4  ;;  %v3290_v12 = vpack.c.bf16 %v401_v11, %v399_v10  ;;  %v4034_v13 = vld [vmem:[%s317_s12] sm:$0xff]  ;;  %v369_v17 = vld [vmem:[%s4473_s5] sm:$0x3]  ;;  %s3754_s15 = smov 112   ;;  %s3755_s18 = smov 120   ;;  %vm1171_vm4 = vcmask 130048  }
  0x90   : > { %3287 = vmatpush1.bf16.msra.mxu0 %v3286_v8  ;;  %v4047_v16 = vsub.s32 0, %v4044_v15  ;;  %v410_v18 = vsub.s32 1, %v4044_v15  ;;  %s3756_s14 = smov 104   ;;  %s3757_s20 = smov 16   ;;  %vm1173_vm5 = vcmask 195584   ;;  %vm1419_vm6 = vcmask 523264  }
  0x91   : > { %3289 = vmatprep.subr.bf16.mxu0 %v3288_v9  ;;  %s3758_s30 = smov 8   ;;  %p363_p11 = scmp.lt.s32.totalorder %s3732_s27, 1 }
  0x92   : > { %v407_v19 = vrot.slane %v369_v17, %v4047_v16  ;;  %v411_v20 = vrot.slane %v369_v17, %v410_v18  ;;  %s3759_s23 = smov 88   ;;  %s3760_s6 = smov 96  }
  0x93   : > { %s364_s16 = scalar_select %p363_p11, %s3732_s27, 1 }
  0x94   : > { %3291 = vmatpush1.bf16.msra.mxu0 %v3290_v12  ;;  %s3761_s12 = smov 80   ;;  %s3762_s9 = smov 72  }
  0x95   : > { %3112 = vmatprep.subr.mxu0 %v3750_v0  ;;  %s365_s21 = scalar_lea.vmem %s4469_s1, %s364_s16  ;;  %s3764_s17 = smov 64  }
  0x96   : > { %v4091_v32 = vld [vmem:[%s365_s21] sm:$0x1]  ;;  %s4501_s11 = sld [smem:[#allocation20_spill]] }
  0x97   : > { %2971 = vmatmul.mubr.msk.f32.vlgmr.msra.gmra.mrb[0].mxu0 %vm414_vm0, %v4034_v13  ;;  %v367_v33 = vsub.f32 1.0, %v4091_v32 }
  0x98   : > { %3114 = vmatprep.mubr.msk.f32.mxu0 %vm3751_vm1, %v3750_v0 }
  0x99   : > { %v368_v34 = vmul.f32 -10000.0, %v367_v33 }
  0x9b   : > { %v4097_v35 = vrot.slane %v368_v34, %v4047_v16  ;;  %v4144_v34 = vld [vmem:[#allocation9 + $0x20] sm:$0xff] }
 0x16a   : > { %v484_v21 = vpop.f32.mrb[0].mxu0 }
 0x16b   : > { %v485_v22 = vadd.f32 %v484_v21, %v407_v19  ;;  %v486_v23 = vpop.f32.mrb[1].mxu0 }
 0x16c   : > { %v4054_v24 = vadd.f32 %v486_v23, %v411_v20 }
 0x16d   : > { %490 = vst.msk [vmem:[#allocation2] sm:$0xff] %vm489_vm2, %v485_v22  ;;  %663 = vrot.lane.b32.xlu1 %v485_v22, %s3752_s13  ;;  %498 = vrot.lane.b32.xlu0 %v485_v22, %s3753_s10 }
 0x16e   : > { %3103 = vmatpush3.xpose.msk.msra.mxu1 %vm500_vm3, %v4054_v24 }
 0x16f   : > { %3107 = vmatprep.subr.mxu1 %v3750_v0 }
 0x171   : > { %830 = vrot.lane.b32.xlu1 %v4054_v24, %s3754_s15  ;;  %665 = vrot.lane.b32.xlu0 %v4054_v24, %s3755_s18 }
 0x175   : > { %995 = vrot.lane.b32.xlu1 %v4054_v24, %s3756_s14  ;;  %828 = vrot.lane.b32.xlu0 %v485_v22, %s3757_s20 }
 0x179   : > { %993 = vrot.lane.b32.xlu0 %v485_v22, %s3758_s30 }
 0x1df   : > { %v664_v25 = vpop.permute.xlu1 %663  ;;  %v499_v26 = vpop.permute.xlu0 %498 }
 0x1e0   : > { %3105 = vmatmul.mubr.msk.f32.vlgmr.msra.gmra.mrb[0].mxu1 %vm500_vm3, %v499_v26 }
 0x1e1   : > { %3109 = vmatprep.mubr.msk.f32.mxu1 %vm3751_vm1, %v3750_v0 }
 0x1e3   : > { %v666_v27 = vpop.permute.xlu0 %665  ;;  %v831_v28 = vpop.permute.xlu1 %830 }
 0x1e4   : > { %3113 = vmatpush3.xpose.msk.msra.mxu0 %vm500_vm3, %v666_v27 }
 0x1e5   : > { %3122 = vmatprep.subr.mxu0 %v3750_v0 }
 0x1e7   : > { %3115 = vmatmul.mubr.msk.f32.vlgmr.msra.gmra.mrb[2].mxu0 %vm500_vm3, %v664_v25  ;;  %v829_v29 = vpop.permute.xlu0 %828  ;;  %v996_v30 = vpop.permute.xlu1 %995 }
 0x1e8   : > { %3123 = vmatpush3.xpose.msk.msra.mxu0 %vm500_vm3, %v831_v28  ;;  %3124 = vmatprep.mubr.msk.f32.mxu0 %vm3751_vm1, %v3750_v0 }
 0x1e9   : > { %3132 = vmatprep.subr.mxu0 %v3750_v0 }
 0x1eb   : > { %3125 = vmatmul.mubr.msk.f32.vlgmr.msra.gmra.mrb[4].mxu0 %vm500_vm3, %v829_v29  ;;  %v994_v31 = vpop.permute.xlu0 %993  ;;  %v4134_v29 = vld [vmem:[#allocation9] sm:$0xff] }
 0x1ec   : > { %3133 = vmatpush3.xpose.msk.msra.mxu0 %vm500_vm3, %v996_v30  ;;  %3134 = vmatprep.mubr.msk.f32.mxu0 %vm3751_vm1, %v3750_v0  ;;  %v4136_v30 = vld [vmem:[#allocation9 + $0x10] sm:$0xff] }
 0x1ef   : > { %3135 = vmatmul.mubr.msk.f32.vlgmr.msra.gmra.mrb[6].mxu0 %vm500_vm3, %v994_v31  ;;  %v4140_v31 = vpack.i.bf16 %v4136_v30, %v4134_v29 }
 0x1f0   : > { %3150 = vmatprep.mubr.msk.f32.mxu0 %vm3751_vm1, %v3750_v0 }
 0x2b3   : > { %v572_v36 = vpop.f32.mrb[0].mxu1 }
 0x2b4   : > { %v573_v37 = vadd.f32 %v572_v36, %v4097_v35  ;;  %v3106_v38 = vpop.f32.mrb[1].mxu1  ;;  %v4146_v36 = vld [vmem:[#allocation9 + $0x30] sm:$0xff] }
 0x2b6   : > { %v576_v39 = vsel %vm500_vm3, %v573_v37, -inf }
 0x2b7   : > { %577 = vmax.xlane.f32.xlu1 %v576_v39 }
 0x2ba   : > { %v737_v40 = vpop.f32.mrb[2].mxu0 }
 0x2bb   : > { %v738_v41 = vadd.f32 %v737_v40, %v4097_v35  ;;  %v3116_v42 = vpop.f32.mrb[3].mxu0 }
 0x2bc   : > { %v3763_v42 = vmov 0.0|0.0  }
 0x2bd   : > { %v741_v43 = vsel %vm500_vm3, %v738_v41, -inf  ;;  %3292 = vmatprep.subr.bf16.mxu0 %v3763_v42 }
 0x2be   : > { %v902_v44 = vpop.f32.mrb[4].mxu0  ;;  %742 = vmax.xlane.f32.xlu0 %v741_v43 }
 0x2bf   : > { %v903_v45 = vadd.f32 %v902_v44, %v4097_v35  ;;  %v3126_v46 = vpop.f32.mrb[5].mxu0 }
 0x2c1   : > { %v906_v47 = vsel %vm500_vm3, %v903_v45, -inf }
 0x2c2   : > { %v1067_v48 = vpop.f32.mrb[6].mxu0  ;;  %907 = vmax.xlane.f32.xlu0 %v906_v47 }
 0x2c3   : > { %v1068_v49 = vadd.f32 %v1067_v48, %v4097_v35  ;;  %v3136_v50 = vpop.f32.mrb[7].mxu0 }
 0x2c5   : > { %v1071_v51 = vsel %vm500_vm3, %v1068_v49, -inf }
 0x2c6   : > { %1072 = vmax.xlane.f32.xlu1 %v1071_v51 }
 0x2d7   : > { %752 = vrot.lane.b32.xlu1 %v4054_v24, %s3759_s23 }
 0x344   : > { %v578_v52 = vpop.xlane.xlu1 %577 }
 0x345   : > { %v579_v53 = vsub.f32 %v573_v37, %v578_v52  ;;  %v4150_v37 = vpack.i.bf16 %v4146_v36, %v4144_v34 }
 0x347   : > { %v580_v54 = vmul.f32 1.442695, %v579_v53  ;;  %v4163_v53 = vld [vmem:[%s4473_s5 + $0x1] ss:$0 sm:$0xff] }
 0x349   : > { %3496 = vpow2.f32 %v580_v54 }
 0x34b   : > { %v743_v55 = vpop.xlane.xlu0 %742 }
 0x34c   : > { %v744_v56 = vsub.f32 %v738_v41, %v743_v55 }
 0x34e   : > { %v745_v57 = vmul.f32 1.442695, %v744_v56 }
 0x34f   : > { %v908_v4 = vpop.xlane.xlu0 %907 }
 0x350   : > { %3498 = vpow2.f32 %v745_v57  ;;  %v909_v5 = vsub.f32 %v903_v45, %v908_v4 }
 0x352   : > { %v910_v6 = vmul.f32 1.442695, %v909_v5  ;;  %v4186_v5 = vld [vmem:[#allocation10 + $0x30] sm:$0xff] }
 0x353   : > { %v3497_v58 = vpop.eup %3496  ;;  %v1073_v59 = vpop.xlane.xlu1 %1072 }
 0x354   : > { %v1074_v60 = vsub.f32 %v1068_v49, %v1073_v59  ;;  %v582_v61 = vsel %vm500_vm3, %v3497_v58, 0.0 }
 0x355   : > { %583 = vadd.xlane.f32.xlu0 %v582_v61 }
 0x356   : > { %v1075_v62 = vmul.f32 1.442695, %v1074_v60 }
 0x357   : > { %v753_v10 = vpop.permute.xlu1 %752 }
 0x358   : > { %3500 = vpow2.f32 %v1075_v62  ;;  %v4174_v62 = vld [vmem:[#allocation10] sm:$0xff] }
 0x359   : > { %3502 = vpow2.f32 %v910_v6  ;;  %v4188_v6 = vld [vmem:[#allocation10 + $0x38] sm:$0xff] }
 0x35a   : > { %v3499_v63 = vpop.eup %3498 }
 0x35b   : > { %v747_v1 = vsel %vm500_vm3, %v3499_v63, 0.0 }
 0x35c   : > { %748 = vadd.xlane.f32.xlu1 %v747_v1 }
 0x362   : > { %v3501_v2 = vpop.eup %3500 }
 0x363   : > { %v1077_v3 = vsel %vm500_vm3, %v3501_v2, 0.0  ;;  %v3503_v7 = vpop.eup %3502 }
 0x364   : > { %1078 = vadd.xlane.f32.xlu1 %v1077_v3  ;;  %v912_v8 = vsel %vm500_vm3, %v3503_v7, 0.0  ;;  %v4182_v3 = vld [vmem:[#allocation10 + $0x28] sm:$0xff] }
 0x36b   : > { %587 = vrot.lane.b32.xlu0 %v4054_v24, %s3760_s6 }
 0x375   : > { %917 = vrot.lane.b32.xlu1 %v4054_v24, %s3761_s12 }
 0x379   : > { %3457 = vrot.lane.b32.xlu1 %v4140_v31, %s3760_s6 }
 0x38a   : > { %913 = vadd.xlane.f32.xlu0 %v912_v8 }
 0x3a0   : > { %1082 = vrot.lane.b32.xlu0 %v4054_v24, %s3762_s9 }
 0x3a4   : > { %3462 = vrot.lane.b32.xlu0 %v4150_v37, %s3760_s6 }
 0x3e2   : > { %v584_v9 = vpop.xlane.xlu0 %583 }
 0x3e3   : > { %3504 = vrcp.f32 %v584_v9 }
 0x3e6   : > { %v588_v11 = vpop.permute.xlu0 %587 }
 0x3e7   : > { %3108 = vmatpush3.msra.mxu1 %v588_v11 }
 0x3e8   : > { %3117 = vmatprep.subr.mxu1 %v3750_v0 }
 0x3e9   : > { %v749_v12 = vpop.xlane.xlu1 %748 }
 0x3ea   : > { %3506 = vrcp.f32 %v749_v12 }
 0x3ed   : > { %v3505_v17 = vpop.eup %3504 }
 0x3ee   : > { %v586_v18 = vmul.f32 %v3505_v17, %v3497_v58 }
 0x3f0   : > { %3110 = vmatmul.mubr.msk.f32.vlgmr.msra.gmra.mrb[2].mxu1 %vm500_vm3, %v586_v18 }
 0x3f1   : > { %3118 = vmatpush3.msra.mxu1 %v753_v10  ;;  %v1079_v19 = vpop.xlane.xlu1 %1078  ;;  %3119 = vmatprep.mubr.msk.f32.mxu1 %vm3751_vm1, %v3750_v0 }
 0x3f2   : > { %3127 = vmatprep.subr.mxu1 %v3750_v0 }
 0x3f4   : > { %v3507_v20 = vpop.eup %3506 }
 0x3f5   : > { %v751_v21 = vmul.f32 %v3507_v20, %v3499_v63  ;;  %v918_v22 = vpop.permute.xlu1 %917  ;;  %v4176_v63 = vld [vmem:[#allocation10 + $0x8] sm:$0xff] }
 0x3f6   : > { %v3329_v1 = vpack.c.bf16 %v4176_v63, %v4174_v62 }
 0x3f7   : > { %3120 = vmatmul.mubr.msk.f32.vlgmr.msra.gmra.mrb[4].mxu1 %vm500_vm3, %v751_v21  ;;  %v3481_v21 = vpack.i.bf16 %v4188_v6, %v4186_v5 }
 0x3f8   : > { %3128 = vmatpush3.msra.mxu1 %v918_v22  ;;  %3129 = vmatprep.mubr.msk.f32.mxu1 %vm3751_vm1, %v3750_v0  ;;  %v4203_v22 = vld [vmem:[#allocation2] sm:$0xff] }
 0x3f9   : > { %3137 = vmatprep.subr.mxu1 %v3750_v0  ;;  %v3458_v38 = vpop.permute.xlu1 %3457 }
 0x3fa   : > { %v3460_v39 = vunpack.i.h.bf16 %v3458_v38  ;;  %v3459_v40 = vunpack.i.l.bf16 %v3458_v38 }
 0x3fc   : > { %v3293_v41 = vpack.c.bf16 %v3460_v39, %v3459_v40  ;;  %v378_v39 = vld [vmem:[#allocation9 + $0x8] sm:$0xff]  ;;  %v379_v40 = vld [vmem:[#allocation9 + $0x18] sm:$0xff] }
 0x3fe   : > { %3294 = vmatpush3.bf16.msra.mxu0 %v3293_v41  ;;  %v380_v41 = vld [vmem:[#allocation9 + $0x28] sm:$0xff] }
 0x3ff   : > { %3295 = vmatprep.subr.bf16.mxu0 %v3763_v42 }
 0x417   : > { %v914_v23 = vpop.xlane.xlu0 %913 }
 0x418   : > { %3508 = vrcp.f32 %v914_v23 }
 0x419   : > { %3510 = vrcp.f32 %v1079_v19  ;;  %v3466_v19 = vpack.i.bf16 %v4176_v63, %v4174_v62 }
 0x41b   : > { %v1083_v27 = vpop.permute.xlu0 %1082 }
 0x41f   : > { %v3463_v43 = vpop.permute.xlu0 %3462 }
 0x420   : > { %v3465_v44 = vunpack.i.h.bf16 %v3463_v43  ;;  %v3464_v45 = vunpack.i.l.bf16 %v3463_v43  ;;  %v3299_v43 = vpack.c.bf16 %v379_v40, %v378_v39 }
 0x422   : > { %v3509_v24 = vpop.eup %3508  ;;  %v3296_v47 = vpack.c.bf16 %v3465_v44, %v3464_v45  ;;  %v381_v44 = vld [vmem:[#allocation9 + $0x38] sm:$0xff] }
 0x423   : > { %v916_v25 = vmul.f32 %v3509_v24, %v3503_v7  ;;  %v3511_v26 = vpop.eup %3510  ;;  %v3338_v7 = vpack.c.bf16 %v4188_v6, %v4186_v5  ;;  %v3302_v45 = vpack.c.bf16 %v381_v44, %v380_v41 }
 0x424   : > { %v1081_v28 = vmul.f32 %v3511_v26, %v3501_v2  ;;  %3297 = vmatpush3.bf16.msra.mxu0 %v3296_v47  ;;  %v4180_v2 = vld [vmem:[#allocation10 + $0x20] sm:$0xff] }
 0x425   : > { %3130 = vmatmul.mubr.msk.f32.vlgmr.msra.gmra.mrb[6].mxu1 %vm500_vm3, %v916_v25  ;;  %3304 = vmatprep.subr.bf16.mxu0 %v3763_v42  ;;  %v3335_v4 = vpack.c.bf16 %v4182_v3, %v4180_v2  ;;  %v3476_v20 = vpack.i.bf16 %v4182_v3, %v4180_v2 }
 0x426   : > { %3138 = vmatpush3.msra.mxu1 %v1083_v27  ;;  %3139 = vmatprep.mubr.msk.f32.mxu1 %vm3751_vm1, %v3750_v0 }
 0x427   : > { %3298 = vmatprep.subr.bf16.mxu1 %v3763_v42 }
 0x429   : > { %3140 = vmatmul.mubr.msk.f32.vlgmr.msra.gmra.mrb[8].mxu1 %vm500_vm3, %v1081_v28 }
 0x42a   : > { %3161 = vmatprep.mubr.msk.f32.mxu1 %vm3751_vm1, %v3750_v0  ;;  %3300 = vmatpush3.bf16.msra.mxu1 %v3299_v43 }
 0x42b   : > { %3301 = vmatprep.subr.bf16.mxu1 %v3763_v42 }
 0x42e   : > { %3303 = vmatpush3.bf16.msra.mxu1 %v3302_v45 }
 0x42f   : > { %3183 = vmatprep.subr.mxu1 %v3750_v0 }
 0x4c3   : > { %v659_v46 = vpop.f32.mrb[2].mxu1 }
 0x4c4   : > { %v3111_v48 = vpop.f32.mrb[3].mxu1 }
 0x4c5   : > { %v4216_v48 = vld [vmem:[%s4473_s5 + $0x2] ss:$0 sm:$0xff] }
 0x4ca   : > { %v824_v49 = vpop.f32.mrb[4].mxu1 }
 0x4cb   : > { %1159 = vrot.lane.b32.xlu1 %v824_v49, %s3758_s30  ;;  %v3121_v50 = vpop.f32.mrb[5].mxu1 }
 0x4f8   : > { %v989_v51 = vpop.f32.mrb[6].mxu1 }
 0x4f9   : > { %1163 = vrot.lane.b32.xlu0 %v989_v51, %s3757_s20  ;;  %v3131_v52 = vpop.f32.mrb[7].mxu1 }
 0x4fc   : > { %v1154_v54 = vpop.f32.mrb[8].mxu1 }
 0x4fd   : > { %1167 = vrot.lane.b32.xlu1 %v1154_v54, %s3752_s13  ;;  %v3141_v55 = vpop.f32.mrb[9].mxu1  ;;  %1196 = vrot.lane.b32.xlu0 %v4163_v53, %s3753_s10 }
 0x53d   : > { %v1160_v56 = vpop.permute.xlu1 %1159 }
 0x53e   : > { %v1170_v58 = vsel %vm500_vm3, %v659_v46, %v1160_v56 }
 0x56b   : > { %v1164_v57 = vpop.permute.xlu0 %1163 }
 0x56c   : > { %v1172_v59 = vsel %vm1171_vm4, %v1170_v58, %v1164_v57  ;;  %v4232_v57 = vld [vmem:[#allocation10 + $0x10] sm:$0xff]  ;;  %v4234_v58 = vld [vmem:[#allocation10 + $0x18] sm:$0xff] }
 0x56f   : > { %v1168_v60 = vpop.permute.xlu1 %1167  ;;  %v1197_v8 = vpop.permute.xlu0 %1196 }
 0x570   : > { %v1174_v61 = vsel %vm1173_vm5, %v1172_v59, %v1168_v60  ;;  %v3332_v59 = vpack.c.bf16 %v4234_v58, %v4232_v57 }
 0x571   : > { %3151 = vmatmul.mubr.msk.f32.vlgmr.msra.gmra.mrb[8].mxu0 %vm414_vm0, %v1174_v61 }
 0x572   : > { %3180 = vmatprep.mubr.msk.f32.mxu0 %vm3751_vm1, %v3750_v0 }
 0x644   : > { %v1268_v9 = vpop.f32.mrb[8].mxu0 }
 0x645   : > { %v1269_v10 = vadd.f32 %v1268_v9, %v1197_v8  ;;  %v3152_v11 = vpop.f32.mrb[9].mxu0 }
 0x647   : > { %v1272_v12 = vadd.f32 %v1269_v10, %v4034_v13 }
 0x649   : > { %v1273_v17 = vmul.f32 %v1272_v12, %v1272_v12 }
 0x64b   : > { %v1274_v18 = vsel %vm414_vm0, %v1273_v17, 0.0  ;;  %v4252_v17 = vld [vmem:[%s4473_s5 + $0x3] ss:$0 sm:$0xff] }
 0x64c   : > { %1275 = vadd.xlane.f32.xlu1 %v1274_v18 }
 0x65d   : > { %3467 = vrot.lane.b32.xlu1 %v3466_v19, %s3764_s17 }
 0x661   : > { %3477 = vrot.lane.b32.xlu1 %v3476_v20, %s3764_s17 }
 0x665   : > { %3482 = vrot.lane.b32.xlu1 %v3481_v21, %s3764_s17 }
 0x669   : > { %1597 = vrot.lane.b32.xlu1 %v4203_v22, %s3764_s17 }
 0x66d   : > { %1673 = vrot.lane.b32.xlu1 %v4203_v22, %s3755_s18 }
 0x6d9   : > { %v1276_v23 = vpop.xlane.xlu1 %1275 }
 0x6da   : > { %v1278_v24 = vmul.f32 0.03125, %v1276_v23 }
 0x6dc   : > { %v1279_v25 = vadd.f32 1e-06, %v1278_v24 }
 0x6dd   : > { %v3468_v26 = vpop.permute.xlu1 %3467 }
 0x6de   : > { %3512 = vrsqrt.f32 %v1279_v25  ;;  %v3470_v27 = vunpack.i.h.bf16 %v3468_v26  ;;  %v3469_v28 = vunpack.i.l.bf16 %v3468_v26 }
 0x6e0   : > { %v3305_v38 = vpack.c.bf16 %v3470_v27, %v3469_v28 }
 0x6e1   : > { %v3478_v51 = vpop.permute.xlu1 %3477 }
 0x6e2   : > { %3306 = vmatpush3.bf16.msra.mxu0 %v3305_v38  ;;  %v3480_v24 = vunpack.i.h.bf16 %v3478_v51  ;;  %v3479_v26 = vunpack.i.l.bf16 %v3478_v51 }
 0x6e3   : > { %3307 = vmatprep.subr.bf16.mxu0 %v3763_v42 }
 0x6e4   : > { %v3311_v39 = vpack.c.bf16 %v3480_v24, %v3479_v26 }
 0x6e5   : > { %v3483_v54 = vpop.permute.xlu1 %3482 }
 0x6e6   : > { %v3485_v40 = vunpack.i.h.bf16 %v3483_v54  ;;  %v3484_v41 = vunpack.i.l.bf16 %v3483_v54 }
 0x6e8   : > { %v3513_v46 = vpop.eup %3512  ;;  %v3314_v44 = vpack.c.bf16 %v3485_v40, %v3484_v41 }
 0x6e9   : > { %v1281_v47 = vmul.f32 %v3513_v46, %v1272_v12  ;;  %v1598_v56 = vpop.permute.xlu1 %1597  ;;  %v3471_v12 = vpack.i.bf16 %v4234_v58, %v4232_v57 }
 0x6eb   : > { %1289 = vrot.lane.b32.xlu0 %v1281_v47, %s3753_s10  ;;  %s4500_s10 = sld [smem:[#allocation19_spill]] }
 0x6ed   : > { %v1674_v54 = vpop.permute.xlu1 %1673 }
 0x75d   : > { %v1290_v49 = vpop.permute.xlu0 %1289 }
 0x75e   : > { %v1292_v50 = vmul.f32 %v4216_v48, %v1290_v49 }
 0x760   : > { %1301 = vrot.lane.b32.xlu0 %v1292_v50, %s3760_s6 }
 0x764   : > { %1509 = vrot.lane.b32.xlu0 %v4203_v22, %s3760_s6 }
 0x7d2   : > { %v1302_v52 = vpop.permute.xlu0 %1301 }
 0x7d3   : > { %3162 = vmatmul.mubr.msk.f32.vlgmr.msra.gmra.mrb[10].mxu1 %vm414_vm0, %v1302_v52 }
 0x7d4   : > { %3185 = vmatprep.mubr.msk.f32.mxu1 %vm3751_vm1, %v3750_v0 }
 0x7d6   : > { %v1510_v55 = vpop.permute.xlu0 %1509 }
 0x7d7   : > { %3184 = vmatpush3.xpose.msk.msra.mxu1 %vm500_vm3, %v1510_v55 }
 0x7d8   : > { %3188 = vmatprep.subr.mxu1 %v3750_v0 }
 0x7da   : > { %3186 = vmatmul.mubr.msk.f32.vlgmr.msra.gmra.mrb[12].mxu1 %vm500_vm3, %v4203_v22 }
 0x7db   : > { %3189 = vmatpush3.msra.mxu1 %v1598_v56  ;;  %3190 = vmatprep.mubr.msk.f32.mxu1 %vm3751_vm1, %v3750_v0 }
 0x7dc   : > { %3193 = vmatprep.subr.mxu1 %v3750_v0 }
 0x8a6   : > { %v1371_v60 = vpop.f32.mrb[10].mxu1 }
 0x8a7   : > { %v3163_v61 = vpop.f32.mrb[11].mxu1  ;;  %v1372_v18 = vadd.f32 %v4252_v17, %v1371_v60 }
 0x8a9   : > { %v1377_v19 = vmul.f32 0.70710677, %v1372_v18  ;;  %v1375_v47 = vmul.f32 0.5, %v1372_v18 }
 0x8ab   : > { %3514 = verf.f32 %v1377_v19 }
 0x8ad   : > { %v1582_v8 = vpop.f32.mrb[12].mxu1 }
 0x8ae   : > { %v1583_v9 = vadd.f32 %v1582_v8, %v4097_v35  ;;  %v3187_v10 = vpop.f32.mrb[13].mxu1 }
 0x8b0   : > { %v1586_v11 = vsel %vm500_vm3, %v1583_v9, -inf }
 0x8b1   : > { %1587 = vmax.xlane.f32.xlu0 %v1586_v11 }
 0x8b5   : > { %v3515_v43 = vpop.eup %3514 }
 0x8b6   : > { %v1379_v45 = vadd.f32 1.0, %v3515_v43 }
 0x8b8   : > { %v1380_v50 = vmul.f32 %v1379_v45, %v1375_v47 }
 0x8c7   : > { %3472 = vrot.lane.b32.xlu0 %v3471_v12, %s3764_s17 }
 0x8cb   : > { %1675 = vrot.lane.b32.xlu0 %v4203_v22, %s3759_s23  ;;  %s3765_s23 = smov 56  }
 0x8cf   : > { %1840 = vrot.lane.b32.xlu0 %v4203_v22, %s3761_s12  ;;  %s3766_s12 = smov 40  }
 0x8d3   : > { %2005 = vrot.lane.b32.xlu0 %v4203_v22, %s3762_s9  ;;  %s3767_s9 = smov 48  }
 0x93e   : > { %v1588_v20 = vpop.xlane.xlu0 %1587 }
 0x93f   : > { %v1589_v21 = vsub.f32 %v1583_v9, %v1588_v20 }
 0x941   : > { %v1590_v23 = vmul.f32 1.442695, %v1589_v21 }
 0x942   : > { %v3473_v25 = vpop.permute.xlu0 %3472 }
 0x943   : > { %3516 = vpow2.f32 %v1590_v23  ;;  %v3475_v27 = vunpack.i.h.bf16 %v3473_v25  ;;  %v3474_v28 = vunpack.i.l.bf16 %v3473_v25 }
 0x945   : > { %v3308_v38 = vpack.c.bf16 %v3475_v27, %v3474_v28 }
 0x946   : > { %v1676_v51 = vpop.permute.xlu0 %1675 }
 0x947   : > { %3309 = vmatpush3.bf16.msra.mxu0 %v3308_v38 }
 0x948   : > { %3310 = vmatprep.subr.bf16.mxu0 %v3763_v42 }
 0x94a   : > { %v1841_v52 = vpop.permute.xlu0 %1840 }
 0x94b   : > { %3312 = vmatpush3.bf16.msra.mxu0 %v3311_v39 }
 0x94c   : > { %3313 = vmatprep.subr.bf16.mxu0 %v3763_v42 }
 0x94d   : > { %v3517_v46 = vpop.eup %3516 }
 0x94e   : > { %v1592_v49 = vsel %vm500_vm3, %v3517_v46, 0.0  ;;  %v2006_v60 = vpop.permute.xlu0 %2005 }
 0x94f   : > { %1593 = vadd.xlane.f32.xlu1 %v1592_v49  ;;  %3315 = vmatpush3.bf16.msra.mxu0 %v3314_v44 }
 0x950   : > { %3203 = vmatprep.subr.mxu0 %v3750_v0 }
 0x952   : > { %3181 = vmatmul.mubr.msk.f32.vlgmr.msra.gmra.mrb[10].mxu0 %vm1419_vm6, %v1380_v50 }
 0x953   : > { %3205 = vmatprep.mubr.msk.f32.mxu0 %vm3751_vm1, %v3750_v0 }
 0x958   : > { %3204 = vmatpush3.xpose.msk.msra.mxu0 %vm500_vm3, %v1841_v52 }
 0x959   : > { %3213 = vmatprep.subr.mxu0 %v3750_v0 }
 0x960   : > { %1838 = vrot.lane.b32.xlu1 %v4203_v22, %s3754_s15 }
 0x964   : > { %2003 = vrot.lane.b32.xlu1 %v4203_v22, %s3756_s14 }
 0x9dc   : > { %v1594_v55 = vpop.xlane.xlu1 %1593 }
 0x9dd   : > { %3518 = vrcp.f32 %v1594_v55 }
 0x9e0   : > { %v1839_v56 = vpop.permute.xlu1 %1838 }
 0x9e1   : > { %3206 = vmatmul.mubr.msk.f32.vlgmr.msra.gmra.mrb[12].mxu0 %vm500_vm3, %v1839_v56 }
 0x9e2   : > { %3214 = vmatpush3.xpose.msk.msra.mxu0 %vm500_vm3, %v2006_v60  ;;  %3215 = vmatprep.mubr.msk.f32.mxu0 %vm3751_vm1, %v3750_v0 }
 0x9e3   : > { %3316 = vmatprep.subr.bf16.mxu0 %v3763_v42 }
 0x9e4   : > { %v2004_v61 = vpop.permute.xlu1 %2003 }
 0x9e5   : > { %3216 = vmatmul.mubr.msk.f32.vlgmr.msra.gmra.mrb[14].mxu0 %vm500_vm3, %v2004_v61 }
 0x9e6   : > { %3231 = vmatprep.mubr.msk.f32.mxu0 %vm3751_vm1, %v3750_v0 }
 0x9e7   : > { %v3519_v8 = vpop.eup %3518 }
 0x9e8   : > { %v1596_v9 = vmul.f32 %v3519_v8, %v3517_v46 }
 0x9ea   : > { %3191 = vmatmul.mubr.msk.f32.vlgmr.msra.gmra.mrb[14].mxu1 %vm500_vm3, %v1596_v9 }
 0x9eb   : > { %3194 = vmatpush3.xpose.msk.msra.mxu1 %vm500_vm3, %v1676_v51  ;;  %3195 = vmatprep.mubr.msk.f32.mxu1 %vm3751_vm1, %v3750_v0 }
 0x9ec   : > { %3198 = vmatprep.subr.mxu1 %v3750_v0 }
 0x9ee   : > { %3196 = vmatmul.mubr.msk.f32.vlgmr.msra.gmra.mrb[16].mxu1 %vm500_vm3, %v1674_v54 }
 0x9ef   : > { %3200 = vmatprep.mubr.msk.f32.mxu1 %vm3751_vm1, %v3750_v0 }
 0xa25   : > { %v4284_v10 = vpop.f32.mrb[10].mxu0 }
 0xa26   : > { %v3182_v11 = vpop.f32.mrb[11].mxu0 }
 0xab4   : > { %v1912_v12 = vpop.f32.mrb[12].mxu0 }
 0xab5   : > { %v1913_v18 = vadd.f32 %v1912_v12, %v4097_v35  ;;  %v3207_v19 = vpop.f32.mrb[13].mxu0 }
 0xab7   : > { %v1916_v20 = vsel %vm500_vm3, %v1913_v18, -inf }
 0xab8   : > { %1917 = vmax.xlane.f32.xlu1 %v1916_v20  ;;  %v2077_v21 = vpop.f32.mrb[14].mxu0 }
 0xab9   : > { %v3217_v23 = vpop.f32.mrb[15].mxu0  ;;  %v2078_v38 = vadd.f32 %v2077_v21, %v4097_v35 }
 0xabb   : > { %v2081_v40 = vsel %vm500_vm3, %v2078_v38, -inf }
 0xabd   : > { %v4288_v24 = vpop.f32.mrb[14].mxu1 }
 0xabe   : > { %v3192_v25 = vpop.f32.mrb[15].mxu1 }
 0xac1   : > { %v1747_v26 = vpop.f32.mrb[16].mxu1 }
 0xac2   : > { %v1748_v27 = vadd.f32 %v1747_v26, %v4097_v35  ;;  %v3197_v28 = vpop.f32.mrb[17].mxu1  ;;  %v3317_v26 = vpack.c.bf16 %v4136_v30, %v4134_v29  ;;  %v2986_v30 = vld [vmem:[%s4473_s5 + $0x4] ss:$0 sm:$0xff] }
 0xac4   : > { %v1751_v39 = vsel %vm500_vm3, %v1748_v27, -inf  ;;  %3318 = vmatpush3.bf16.msra.mxu0 %v3317_v26 }
 0xac5   : > { %1752 = vmax.xlane.f32.xlu0 %v1751_v39  ;;  %3319 = vmatprep.subr.bf16.mxu0 %v3763_v42 }
 0xac9   : > { %2082 = vmax.xlane.f32.xlu0 %v2081_v40 }
 0xb45   : > { %v1918_v41 = vpop.xlane.xlu1 %1917 }
 0xb46   : > { %v1919_v43 = vsub.f32 %v1913_v18, %v1918_v41 }
 0xb48   : > { %v1920_v44 = vmul.f32 1.442695, %v1919_v43 }
 0xb4a   : > { %3520 = vpow2.f32 %v1920_v44 }
 0xb52   : > { %v1753_v45 = vpop.xlane.xlu0 %1752 }
 0xb53   : > { %v1754_v47 = vsub.f32 %v1748_v27, %v1753_v45  ;;  %v3320_v27 = vpack.c.bf16 %v4146_v36, %v4144_v34  ;;  %v1490_v34 = vadd.f32 %v2986_v30, %v4284_v10  ;;  %v4336_v36 = vld [vmem:[%s4500_s10] sm:$0xff] }
 0xb54   : > { %v3521_v46 = vpop.eup %3520 }
 0xb55   : > { %v1922_v49 = vsel %vm500_vm3, %v3521_v46, 0.0  ;;  %v1755_v52 = vmul.f32 1.442695, %v1754_v47  ;;  %3321 = vmatpush3.bf16.msra.mxu0 %v3320_v27 }
 0xb56   : > { %1923 = vadd.xlane.f32.xlu1 %v1922_v49  ;;  %v2083_v50 = vpop.xlane.xlu0 %2082  ;;  %3328 = vmatprep.subr.bf16.mxu0 %v3763_v42 }
 0xb57   : > { %v2084_v51 = vsub.f32 %v2078_v38, %v2083_v50 }
 0xb59   : > { %v2085_v35 = vmul.f32 1.442695, %v2084_v51 }
 0xb5b   : > { %3522 = vpow2.f32 %v2085_v35 }
 0xb5c   : > { %3524 = vpow2.f32 %v1755_v52 }
 0xb65   : > { %v3523_v54 = vpop.eup %3522 }
 0xb66   : > { %v2087_v55 = vsel %vm500_vm3, %v3523_v54, 0.0  ;;  %v3525_v56 = vpop.eup %3524 }
 0xb67   : > { %1762 = vrot.lane.b32.xlu1 %v4203_v22, %s3765_s23  ;;  %2088 = vadd.xlane.f32.xlu0 %v2087_v55  ;;  %v1757_v60 = vsel %vm500_vm3, %v3525_v56, 0.0 }
 0xb6b   : > { %2092 = vrot.lane.b32.xlu1 %v4203_v22, %s3766_s12  ;;  %1758 = vadd.xlane.f32.xlu0 %v1757_v60  ;;  %s2821_s12 = scalar_lea.sflag [#allocation6], %s4016_s22 }
 0xb81   : > { %1927 = vrot.lane.b32.xlu0 %v4203_v22, %s3767_s9 }
 0xbe3   : > { %v1924_v61 = vpop.xlane.xlu1 %1923 }
 0xbe7   : > { %v1763_v8 = vpop.permute.xlu1 %1762 }
 0xbe8   : > { %3199 = vmatpush3.msra.mxu1 %v1763_v8 }
 0xbe9   : > { %3208 = vmatprep.subr.mxu1 %v3750_v0 }
 0xbeb   : > { %v2093_v23 = vpop.permute.xlu1 %2092 }
 0xbf4   : > { %v2089_v9 = vpop.xlane.xlu0 %2088 }
 0xbf8   : > { %v1759_v11 = vpop.xlane.xlu0 %1758 }
 0xbf9   : > { %3526 = vrcp.f32 %v1759_v11 }
 0xbfa   : > { %3528 = vrcp.f32 %v1924_v61 }
 0xbfb   : > { %3530 = vrcp.f32 %v2089_v9 }
 0xbfc   : > { %v1928_v20 = vpop.permute.xlu0 %1927 }
 0xc03   : > { %v3527_v12 = vpop.eup %3526 }
 0xc04   : > { %v1761_v18 = vmul.f32 %v3527_v12, %v3525_v56  ;;  %v3529_v19 = vpop.eup %3528 }
 0xc05   : > { %v1926_v22 = vmul.f32 %v3529_v19, %v3521_v46  ;;  %v3531_v21 = vpop.eup %3530 }
 0xc06   : > { %3201 = vmatmul.mubr.msk.f32.vlgmr.msra.gmra.mrb[18].mxu1 %vm500_vm3, %v1761_v18  ;;  %v2091_v25 = vmul.f32 %v3531_v21, %v3523_v54 }
 0xc07   : > { %3209 = vmatpush3.msra.mxu1 %v1928_v20  ;;  %3210 = vmatprep.mubr.msk.f32.mxu1 %vm3751_vm1, %v3750_v0 }
 0xc08   : > { %3218 = vmatprep.subr.mxu1 %v3750_v0 }
 0xc0a   : > { %3211 = vmatmul.mubr.msk.f32.vlgmr.msra.gmra.mrb[20].mxu1 %vm500_vm3, %v1926_v22 }
 0xc0b   : > { %3219 = vmatpush3.msra.mxu1 %v2093_v23  ;;  %3220 = vmatprep.mubr.msk.f32.mxu1 %vm3751_vm1, %v3750_v0 }
 0xc0c   : > { %3322 = vmatprep.subr.bf16.mxu1 %v3763_v42 }
 0xc0e   : > { %3221 = vmatmul.mubr.msk.f32.vlgmr.msra.gmra.mrb[22].mxu1 %vm500_vm3, %v2091_v25 }
 0xc0f   : > { %3242 = vmatprep.mubr.msk.f32.mxu1 %vm3751_vm1, %v3750_v0 }
 0xcd9   : > { %v1834_v28 = vpop.f32.mrb[18].mxu1 }
 0xcda   : > { %2169 = vrot.lane.b32.xlu1 %v1834_v28, %s3758_s30  ;;  %v3202_v38 = vpop.f32.mrb[19].mxu1 }
 0xcdd   : > { %v1999_v39 = vpop.f32.mrb[20].mxu1 }
 0xcde   : > { %2173 = vrot.lane.b32.xlu0 %v1999_v39, %s3757_s20  ;;  %v3212_v40 = vpop.f32.mrb[21].mxu1 }
 0xce1   : > { %v2164_v41 = vpop.f32.mrb[22].mxu1 }
 0xce2   : > { %2190 = vrot.lane.b32.xlu0 %v4163_v53, %s3764_s17  ;;  %2177 = vrot.lane.b32.xlu1 %v2164_v41, %s3752_s13  ;;  %v3222_v29 = vpop.f32.mrb[23].mxu1  ;;  %v2475_v41 = vand.u32 127, %v404_v14  ;;  %s2970_s13 = sshll.u32 %s4016_s22, 5 }
 0xce3   : > { %v2476_v29 = vsub.f32 0.0, %v367_v33 }
 0xce4   : > { %vm2478_vm7 = vcmp.gt.s32.totalorder %v4044_v15, %v2475_v41 }
 0xce5   : > { %v2477_v30 = vmul.f32 1e+12, %v2476_v29 }
 0xce6   : > { %3487 = vrot.lane.b32.xlu0 %v4140_v31, %s3764_s17  ;;  %v1493_v31 = vmul.f32 %v1490_v34, %v4336_v36  ;;  %v3003_v34 = vsel %vm2478_vm7, 1.0, %v3750_v0 }
 0xcea   : > { %3492 = vrot.lane.b32.xlu0 %v4150_v37, %s3764_s17 }
 0xcee   : > { %2301 = vrot.lane.b32.xlu0 %v4216_v48, %s3764_s17 }
 0xcf2   : > { %2388 = vrot.lane.b32.xlu0 %v4252_v17, %s3764_s17 }
 0xcf6   : > { %1495 = vrot.lane.b32.xlu0 %v1493_v31, %s3760_s6 }
 0xd4c   : > { %v2170_v37 = vpop.permute.xlu1 %2169 }
 0xd4d   : > { %v2180_v43 = vsel %vm500_vm3, %v4288_v24, %v2170_v37  ;;  %v2569_v37 = vrot.slane %v4091_v32, %v4047_v16 }
 0xd50   : > { %v2174_v53 = vpop.permute.xlu0 %2173 }
 0xd51   : > { %v2182_v44 = vsel %vm1171_vm4, %v2180_v43, %v2174_v53 }
 0xd54   : > { %v2191_v10 = vpop.permute.xlu0 %2190  ;;  %v2178_v45 = vpop.permute.xlu1 %2177 }
 0xd55   : > { %v2184_v46 = vsel %vm1173_vm5, %v2182_v44, %v2178_v45 }
 0xd56   : > { %3232 = vmatmul.mubr.msk.f32.vlgmr.msra.gmra.mrb[16].mxu0 %vm414_vm0, %v2184_v46 }
 0xd57   : > { %3330 = vmatpush3.bf16.msra.mxu0 %v3329_v1  ;;  %3261 = vmatprep.mubr.msk.f32.mxu0 %vm3751_vm1, %v3750_v0 }
 0xd58   : > { %v3488_v17 = vpop.permute.xlu0 %3487  ;;  %3331 = vmatprep.subr.bf16.mxu0 %v3763_v42 }
 0xd59   : > { %v3490_v47 = vunpack.i.h.bf16 %v3488_v17  ;;  %v3489_v24 = vunpack.i.l.bf16 %v3488_v17 }
 0xd5b   : > { %v3323_v49 = vpack.c.bf16 %v3490_v47, %v3489_v24  ;;  %3333 = vmatpush3.bf16.msra.mxu0 %v3332_v59 }
 0xd5c   : > { %v3493_v50 = vpop.permute.xlu0 %3492  ;;  %3334 = vmatprep.subr.bf16.mxu0 %v3763_v42 }
 0xd5d   : > { %v3495_v51 = vunpack.i.h.bf16 %v3493_v50  ;;  %v3494_v52 = vunpack.i.l.bf16 %v3493_v50  ;;  %3324 = vmatpush3.bf16.msra.mxu1 %v3323_v49 }
 0xd5e   : > { %3325 = vmatprep.subr.bf16.mxu1 %v3763_v42 }
 0xd5f   : > { %v3326_v62 = vpack.c.bf16 %v3495_v51, %v3494_v52  ;;  %3336 = vmatpush3.bf16.msra.mxu0 %v3335_v4 }
 0xd60   : > { %v2302_v63 = vpop.permute.xlu0 %2301  ;;  %3337 = vmatprep.subr.bf16.mxu0 %v3763_v42 }
 0xd61   : > { %3327 = vmatpush3.bf16.msra.mxu1 %v3326_v62 }
 0xd62   : > { %3264 = vmatprep.subr.mxu1 %v3750_v0 }
 0xd63   : > { %3339 = vmatpush3.bf16.msra.mxu0 %v3338_v7 }
 0xd64   : > { %v2389_v1 = vpop.permute.xlu0 %2388 }
 0xd68   : > { %v1496_v57 = vpop.permute.xlu0 %1495 }
 0xd69   : > { %v1498_v58 = vadd.f32 %v1496_v57, %v1493_v31  ;;  %v2486_v31 = vrot.slane %v2477_v30, %v4047_v16 }
 0xd6b   : > { %1499 = vst.msk [vmem:[#allocation3] sm:$0xff] %vm414_vm0, %v1498_v58 }
 0xd72   : > { %v2471_v60 = vld [vmem:[#allocation3] sm:$0xff] }
 0xe29   : > { %v2263_v59 = vpop.f32.mrb[16].mxu0 }
 0xe2a   : > { %v2264_v35 = vadd.f32 %v2263_v59, %v2191_v10  ;;  %v3233_v54 = vpop.f32.mrb[17].mxu0 }
 0xe2c   : > { %v2267_v2 = vadd.f32 %v2264_v35, %v4034_v13 }
 0xe2e   : > { %v2268_v3 = vmul.f32 %v2267_v2, %v2267_v2 }
 0xe30   : > { %v2269_v42 = vsel %vm414_vm0, %v2268_v3, 0.0 }
 0xe31   : > { %2270 = vadd.xlane.f32.xlu1 %v2269_v42 }
 0xebe   : > { %v2271_v4 = vpop.xlane.xlu1 %2270 }
 0xebf   : > { %v2273_v55 = vmul.f32 0.03125, %v2271_v4 }
 0xec1   : > { %v2274_v56 = vadd.f32 1e-06, %v2273_v55 }
 0xec3   : > { %3532 = vrsqrt.f32 %v2274_v56 }
 0xecd   : > { %v3533_v5 = vpop.eup %3532 }
 0xece   : > { %v2276_v6 = vmul.f32 %v3533_v5, %v2267_v2 }
 0xed0   : > { %v2283_v7 = vmul.f32 %v4216_v48, %v2276_v6 }
 0xed2   : > { %3243 = vmatmul.mubr.msk.f32.vlgmr.msra.gmra.mrb[24].mxu1 %vm414_vm0, %v2283_v7 }
 0xed3   : > { %3265 = vmatpush3.xpose.msk.msra.mxu1 %vm500_vm3, %v2471_v60  ;;  %3266 = vmatprep.mubr.msk.f32.mxu1 %vm3751_vm1, %v3750_v0 }
 0xed4   : > { %3269 = vmatprep.subr.mxu1 %v3750_v0 }
 0xfa5   : > { %v2373_v13 = vpop.f32.mrb[24].mxu1 }
 0xfa6   : > { %v2374_v61 = vadd.f32 %v2373_v13, %v2302_v63  ;;  %v3244_v8 = vpop.f32.mrb[25].mxu1 }
 0xfa8   : > { %v2379_v9 = vmul.f32 0.70710677, %v2374_v61  ;;  %v2377_v12 = vmul.f32 0.5, %v2374_v61 }
 0xfaa   : > { %3534 = verf.f32 %v2379_v9 }
 0xfb4   : > { %v3535_v11 = vpop.eup %3534 }
 0xfb5   : > { %v2381_v18 = vadd.f32 1.0, %v3535_v11 }
 0xfb7   : > { %v2382_v19 = vmul.f32 %v2381_v18, %v2377_v12 }
 0xfb9   : > { %3262 = vmatmul.mubr.msk.f32.vlgmr.msra.gmra.mrb[18].mxu0 %vm1419_vm6, %v2382_v19 }
0x108c   : > { %v2461_v48 = vpop.f32.mrb[18].mxu0 }
0x108d   : > { %v2462_v20 = vadd.f32 %v2461_v48, %v2389_v1  ;;  %v3263_v22 = vpop.f32.mrb[19].mxu0 }
0x108f   : > { %v2465_v21 = vmul.f32 %v2462_v20, %v4336_v36  ;;  %v2481_v36 = vmul.f32 1e+12, %v3003_v34 }
0x1091   : > { %2467 = vrot.lane.b32.xlu0 %v2465_v21, %s3760_s6  ;;  %v2488_v53 = vsub.f32 %v2486_v31, %v2481_v36 }
0x1095   : > { %2576 = vrot.lane.b32.xlu0 %v2471_v60, %s3755_s18 }
0x1099   : > { %2658 = vrot.lane.b32.xlu0 %v2471_v60, %s3754_s15 }
0x1103   : > { %v2468_v23 = vpop.permute.xlu0 %2467 }
0x1104   : > { %v2470_v25 = vadd.f32 %v2468_v23, %v2465_v21 }
0x1106   : > { %2656 = vrot.lane.b32.xlu1 %v2470_v25, %s3754_s15  ;;  %2574 = vrot.lane.b32.xlu0 %v2470_v25, %s3755_s18  ;;  %s362_s15 = scalar_lea.vmem [#allocation12], %s2970_s13 }
0x1107   : > { %3267 = vmatmul.mubr.msk.f32.vlgmr.msra.gmra.mrb[26].mxu1 %vm500_vm3, %v2470_v25  ;;  %v2577_v26 = vpop.permute.xlu0 %2576  ;;  %s2835_s18 = sshll.u32 %s362_s15, 4  ;;  %s4412_s18 = int_to_ptr.vmem [resolvable:$true] %s2835_s18 }
0x1108   : > { %3270 = vmatpush3.xpose.msk.msra.mxu1 %vm500_vm3, %v2577_v26  ;;  %3271 = vmatprep.mubr.msk.f32.mxu1 %vm3751_vm1, %v3750_v0  ;;  %s3650_s9 = scalar_lea.vmem %s4412_s18, 512 }
0x1109   : > { %3274 = vmatprep.subr.mxu1 %v3750_v0  ;;  %p3651_p6 = scmp.ne.s32.totalorder %s4412_s18, %s3650_s9 }
0x110a   : > { %2740 = vrot.lane.b32.xlu0 %v2471_v60, %s3756_s14 }
0x110b   : > { %v2659_v27 = vpop.permute.xlu0 %2658  ;;  %p3652_p3 = pnand %p3651_p6, %p3961_p10 }
0x110d   : > { %p3653_p5 = pneg %p3652_p3 }
0x110e   : > { %2738 = vrot.lane.b32.xlu0 %v2470_v25, %s3756_s14  ;;  %s3020_s14 = sshll.u32 %s3732_s27, 9  ;;  %s3768_s27 = smov [#allocation12]  }
0x110f   : > { %s4417_s23 = scalar_lea.hbm %s4501_s11, %s3020_s14  ;;  %s3654_s16 = sshll.u32 %s3768_s27, 4  ;;  %s3655_s16 = int_to_ptr.vmem [resolvable:$false] %s3654_s16 }
0x1110   : > { %s3656_s19 = scalar_lea.vmem %s3655_s16, 1024  ;;  %p3657_p7 = scmp.lt.s32.totalorder %s4412_s18, %s3655_s16 }
0x1111   : > { %p3658_p9 = scmp.lt.s32.totalorder %s3656_s19, %s3650_s9 }
0x1113   : > { %p3659_p0 = por %p3658_p9, %p3657_p7 }
0x1115   : > { %p3660_p4 = pnand %p3659_p0, %p3653_p5 }
0x1178   : > { %v2575_v28 = vpop.permute.xlu0 %2574  ;;  %v2657_v38 = vpop.permute.xlu1 %2656 }
0x1179   : > { %3272 = vmatmul.mubr.msk.f32.vlgmr.msra.gmra.mrb[28].mxu1 %vm500_vm3, %v2575_v28 }
0x117a   : > { %3275 = vmatpush3.xpose.msk.msra.mxu1 %vm500_vm3, %v2659_v27  ;;  %3276 = vmatprep.mubr.msk.f32.mxu1 %vm3751_vm1, %v3750_v0 }
0x117b   : > { %3279 = vmatprep.subr.mxu1 %v3750_v0 }
0x117c   : > { %v2741_v39 = vpop.permute.xlu0 %2740 }
0x117d   : > { %3277 = vmatmul.mubr.msk.f32.vlgmr.msra.gmra.mrb[30].mxu1 %vm500_vm3, %v2657_v38 }
0x117e   : > { %3280 = vmatpush3.xpose.msk.msra.mxu1 %vm500_vm3, %v2741_v39  ;;  %3281 = vmatprep.mubr.msk.f32.mxu1 %vm3751_vm1, %v3750_v0 }
0x1180   : > { %v2739_v40 = vpop.permute.xlu0 %2738 }
0x1181   : > { %3282 = vmatmul.mubr.msk.f32.vlgmr.msra.gmra.mrb[32].mxu1 %vm500_vm3, %v2739_v40 }
0x11da   : > { %v2561_v43 = vpop.f32.mrb[26].mxu1 }
0x11db   : > { %v2571_v44 = vmul.f32 %v2569_v37, %v2561_v43  ;;  %v3268_v14 = vpop.f32.mrb[27].mxu1 }
0x11dd   : > { %v2572_v10 = vadd.f32 %v2571_v44, %v2488_v53 }
0x11df   : > { %2573 = vst.msk [vmem:[%s362_s15] sm:$0xff] %vm500_vm3, %v2572_v10 }
0x124c   : > { %v2648_v15 = vpop.f32.mrb[28].mxu1 }
0x124d   : > { %v2652_v33 = vmul.f32 %v2648_v15, %v2569_v37  ;;  %v3273_v45 = vpop.f32.mrb[29].mxu1 }
0x124f   : > { %v2653_v0 = vadd.f32 %v2652_v33, %v2488_v53 }
0x1250   : > { %v2730_v46 = vpop.f32.mrb[30].mxu1 }
0x1251   : > { %3008 = vst.msk [vmem:[%s362_s15 + $0x8] sm:$0xff] %vm500_vm3, %v2653_v0  ;;  %v2734_v17 = vmul.f32 %v2730_v46, %v2569_v37  ;;  %v3278_v16 = vpop.f32.mrb[31].mxu1 }
0x1253   : > { %v2735_v32 = vadd.f32 %v2734_v17, %v2488_v53 }
0x1254   : > { %v2812_v47 = vpop.f32.mrb[32].mxu1 }
0x1255   : > { %3011 = vst.msk [vmem:[%s362_s15 + $0x10] sm:$0xff] %vm500_vm3, %v2735_v32  ;;  %v2816_v24 = vmul.f32 %v2812_v47, %v2569_v37  ;;  %v3283_v49 = vpop.f32.mrb[33].mxu1 }
0x1257   : > { %v2817_v50 = vadd.f32 %v2816_v24, %v2488_v53 }
0x1259   : > { %3014 = vst.msk [vmem:[%s362_s15 + $0x18] sm:$0xff] %vm500_vm3, %v2817_v50 }
0x125a   : > { %3663 = shalt.err (!%p3660_p4)
}
0x125b   : > { %s3664_s20 = scalar_lea.hbm %s4417_s23, 512  ;;  %s3668_s13 = scalar_lea.hbm %s4501_s11, 1024 }
0x125c   : > { %p3665_p2 = scmp.ne.s32.totalorder %s4417_s23, %s3664_s20  ;;  %p3669_p12 = scmp.lt.u32.totalorder %s4417_s23, %s4501_s11 }
0x125d   : > { %p3670_p13 = scmp.lt.u32.totalorder %s3668_s13, %s3664_s20  ;;  %p3672_p6 = scmp.lt.u32.totalorder %s3664_s20, %s4417_s23 }
0x125e   : > { %p3666_p8 = pnand %p3665_p2, %p3961_p10 }
0x125f   : > { %p3671_p11 = por %p3670_p13, %p3669_p12 }
0x1260   : > { %p3667_p1 = pneg %p3666_p8 }
0x1261   : > { %p3673_p3 = por %p3672_p6, %p3671_p11 }
0x1263   : > { %p3674_p5 = pnand %p3673_p3, %p3667_p1 }
0x1265   : > { %3677 = shalt.err (!%p3674_p5)
}
0x1266   : > { %s3769_s6 = smov 128  }
0x1267   : > { %3354 = dma.vmem_to_hbm [thread:$0]  (%p3961_p10), %s4412_s18, 512, %s4417_s23, %s2821_s12, %s3769_s6, %s3769_s6, %s3758_s30  }
0x1268 PF: > { %s4502_s17 = sld [smem:[#allocation17_spill]]  ;;  %s4503_s9 = sld [smem:[#allocation18_spill]] }
0x1269   : > { %p4505_p9 = scmp.ge.s32.totalorder %s3740_s29, 2 }
0x126e   : > { %s2850_s27 = sand.u32 1, %s4502_s17   ;;  %p4504_p7 = scmp.ne.s32.totalorder %s4503_s9, 0 }
0x126f   : > { %s2851_s16 = scalar_lea.sflag [#allocation6], %s2850_s27 }
0x1270   : > { %p3371_p0 = pnand %p4505_p9, %p4504_p7 }
0x1272   : > { %3715 = dma.done.wait (!%p3371_p0), %s2851_s16, 512  }
0x1273   : > { %3717 = vsyncadd (!%p3371_p0), %s2851_s16, 4294966784  ;;  %s25_s29 = sadd.s32 1, %s3740_s29   ;;  %s4506_s24 = smov %s3724_s25 }
0x1274   : > { %p22_p4 = scmp.ge.s32.totalorder %s25_s29, 4   ;;  %s4507_s25 = smov %s3728_s26 }
0x1275   : > { %s4508_s26 = smov %s3973_s8  ;;  %s4509_s27 = smov %s3736_s28 }
0x1276   : > { %s4510_s28 = smov %s4512_s7  ;;  %24 = sbr.rel (!%p22_p4) target bundleno = 11 (0xb), region = 115 }
0x127d   :  { %2856 = vsyncpa [#allocation5], 1 }
0x127e   :  { %2858 = vsyncpa [#allocation5 + $0x1], 1 }
0x127f   :  { %2859 = vsyncpa [#allocation8], 1 }
0x1280   :  { %2860 = vsyncpa [#allocation11], 1 }
0x1281   :  { %2861 = vsyncpa [#allocation6], 1 }
0x1282   :  { %2863 = vsyncpa [#allocation6 + $0x1], 1 }

</bundles_post_ra>
